<compile_context>
chip_gen: v6e
topology: v6e:2x2x1
jax: 0.10.0
libtpu: 0.0.40
codegen_flags: <defaults>
</compile_context>

<pallas_src>
import functools

import jax
import jax.numpy as jnp
from jax.experimental import pallas as pl
from jax.experimental.pallas import tpu as pltpu


def _transp_conv_fused_kernel(x_ref, w_ref, b_ref, e_ref, o_ref, *, th, W, Cout):
    # x_ref: (1, Cin, tm)      tm = th*W  -- NCHW tile, flat spatial on lanes
    # w_ref: (4*Cout, Cin)     rows ordered (ki, kj, co); resident in VMEM
    # b_ref: (4*Cout, 1) f32   resident
    # e_ref: (2, W, 2W) f32    column-interleave matrices: E_kj[c, 2c+kj] = 1; resident
    # o_ref: (1, Cout, 4*tm)   final NCHW-flat output tile (output rows [2*i*th, 2*(i+1)*th))
    y = jnp.dot(w_ref[...], x_ref[0], preferred_element_type=jnp.float32)
    y = y + b_ref[...]                                    # (4*Cout, tm) f32
    e0 = e_ref[0]                                         # (W, 2W)
    e1 = e_ref[1]
    # (ki, kj) channel planes, each (Cout, tm)
    a = [[y[(2 * ki + kj) * Cout:(2 * ki + kj + 1) * Cout, :] for kj in range(2)]
         for ki in range(2)]
    W2 = 2 * W
    for r in range(th):                                   # static unroll; th kept small
        lo = r * W
        for ki in range(2):
            # column (kj) interleave: row[:, 2c+kj] = a[ki][kj][:, c]  (exact 0/1 matmul)
            row = (jnp.dot(a[ki][0][:, lo:lo + W], e0, preferred_element_type=jnp.float32)
                   + jnp.dot(a[ki][1][:, lo:lo + W], e1, preferred_element_type=jnp.float32))
            # row (ki) interleave == static lane offset in the flat NCHW output block
            off = (2 * r + ki) * W2
            o_ref[0, :, off:off + W2] = row.astype(o_ref.dtype)


def _pick_rows_per_step(H, W, want_rows, cap_rows, need_split):
    """Largest divisor th of H with (th*W) % 128 == 0 (or th == H), th <= bounds."""
    limit = max(1, min(want_rows, cap_rows))
    feas = [d for d in range(1, H + 1)
            if H % d == 0 and ((d * W) % 128 == 0 or d == H)]
    if need_split:  # prefer >= 2 grid steps so both v7x TensorCores get work
        small = [d for d in feas if d <= max(1, H // 2)]
        if small:
            feas = small
    under = [d for d in feas if d <= limit]
    return max(under) if under else min(feas)


@jax.jit
def upsample_block_transp_conv(x, w, b):
    """ConvTranspose2d(kernel_size=2, stride=2) forward.

    x: (N, Cin, H, W)    [NCHW, like PyTorch]
    w: (Cin, Cout, 2, 2) [PyTorch ConvTranspose2d weight layout]
    b: (Cout,)
    returns: (N, Cout, 2H, 2W)
    """
    N, Cin, H, W = x.shape
    _, Cout, KH, KW = w.shape
    assert KH == 2 and KW == 2
    HW = H * W

    # ---- free (metadata-only) reshape: NCHW is contiguous, no HBM traffic ----
    x2 = x.reshape(N, Cin, HW)

    # ---- tiny parameter prep (negligible) ----
    # wt[(ki*2+kj)*Cout + co, ci] = w[ci, co, ki, kj]
    wt = jnp.transpose(w, (2, 3, 1, 0)).reshape(4 * Cout, Cin).astype(x.dtype)
    bt = jnp.tile(b.astype(jnp.float32), 4).reshape(4 * Cout, 1)
    lane = jnp.arange(2 * W)[None, :]
    col = jnp.arange(W)[:, None]
    e = jnp.stack([(lane == 2 * col).astype(jnp.float32),
                   (lane == 2 * col + 1).astype(jnp.float32)], axis=0)   # (2, W, 2W)

    # ---- generation-aware VMEM budget (includes the f32 accumulator) ----
    try:
        vmem_cap = int(pltpu.get_tpu_info().vmem_capacity_bytes)
    except Exception:  # pragma: no cover - conservative v7x-safe fallback
        vmem_cap = 64 * 1024 * 1024
    s = x.dtype.itemsize
    resident = (2 * 4 * Cout * Cin * s          # weights (double-buffered by default)
                + 2 * 4 * Cout * 4              # bias
                + 2 * 2 * W * 2 * W * 4)        # interleave matrices
    # per input row (W pixels): double-buffered in/out tiles + f32 accumulator
    # (x2 slack for slicing temporaries).
    per_row = W * (2 * Cin * s + 2 * 4 * Cout * s + 2 * 4 * Cout * 4)
    budget = int(0.45 * vmem_cap)
    cap_rows = max(1, (budget - resident) // per_row)
    target_tm = 2048 if vmem_cap >= 100 * 1024 * 1024 else 1024
    want_rows = min(64, max(1, target_tm // W))            # also bounds the static unroll
    th = _pick_rows_per_step(H, W, want_rows, cap_rows, need_split=(N == 1))
    tm = th * W
    n_r = H // th

    est = resident + per_row * th
    vmem_limit = int(min(max(32 * 1024 * 1024, est + (8 << 20)),
                         vmem_cap - (8 << 20),
                         100 * 1024 * 1024))

    cost = pl.CostEstimate(
        flops=2 * N * HW * 4 * Cout * Cin + 16 * N * H * Cout * W * W,
        transcendentals=0,
        bytes_accessed=N * HW * Cin * s + N * 4 * HW * Cout * s + 4 * Cout * Cin * s,
    )

    kernel = functools.partial(_transp_conv_fused_kernel, th=th, W=W, Cout=Cout)

    yflat = pl.pallas_call(
        kernel,
        out_shape=jax.ShapeDtypeStruct((N, Cout, 4 * HW), x.dtype),
        grid_spec=pltpu.PrefetchScalarGridSpec(
            num_scalar_prefetch=0,
            grid=(N, n_r),
            in_specs=[
                pl.BlockSpec((1, Cin, tm), lambda n, i: (n, 0, i)),
                pl.BlockSpec((4 * Cout, Cin), lambda n, i: (0, 0)),
                pl.BlockSpec((4 * Cout, 1), lambda n, i: (0, 0)),
                pl.BlockSpec((2, W, 2 * W), lambda n, i: (0, 0, 0)),
            ],
            out_specs=pl.BlockSpec((1, Cout, 4 * tm), lambda n, i: (n, 0, i)),
        ),
        compiler_params=pltpu.CompilerParams(
            dimension_semantics=("parallel", "parallel"),
            vmem_limit_bytes=vmem_limit,
        ),
        cost_estimate=cost,
    )(x2, wt, bt, e)

    # free metadata reshape: the kernel already wrote interleaved NCHW rows/cols
    return yflat.reshape(N, Cout, 2 * H, 2 * W)


def _reference(x, w, b):
    # out[n, co, 2i+ki, 2j+kj] = sum_ci x[n,ci,i,j] * w[ci,co,ki,kj] + b[co]
    N, Cin, H, W = x.shape
    _, Cout, KH, KW = w.shape
    t = jnp.einsum("ncij,cokl->noijkl", x, w)              # (N, Cout, H, W, 2, 2)
    t = jnp.transpose(t, (0, 1, 2, 4, 3, 5)).reshape(N, Cout, KH * H, KW * W)
    return t + b[None, :, None, None]


if __name__ == "__main__":
    key = jax.random.PRNGKey(0)
    k_x, k_w, k_b, k_x2, k_w2, k_b2, k_x3, k_w3, k_b3 = jax.random.split(key, 9)

    # ---- Case 1: f32, shapes consistent with the module (batch=2, channels=4, 16x16) ----
    N, Cin, Cout, H, W = 2, 4, 4, 16, 16
    bound = (1.0 / (Cin * 2 * 2)) ** 0.5
    x = jax.random.normal(k_x, (N, Cin, H, W), dtype=jnp.float32)
    w = jax.random.uniform(k_w, (Cin, Cout, 2, 2), dtype=jnp.float32,
                           minval=-bound, maxval=bound)
    b = jax.random.uniform(k_b, (Cout,), dtype=jnp.float32, minval=-bound, maxval=bound)
    out = jax.block_until_ready(upsample_block_transp_conv(x, w, b))
    ref = _reference(x, w, b)
    assert out.shape == (N, Cout, 2 * H, 2 * W), out.shape
    assert jnp.allclose(out, ref, atol=1e-5, rtol=1e-5), "f32 mismatch vs reference"

    # ---- Case 2: bf16 activations/weights (intended production dtype), non-pow2 H ----
    N2, Ci2, Co2, H2, W2 = 1, 8, 6, 12, 16
    bound2 = (1.0 / (Ci2 * 2 * 2)) ** 0.5
    x2 = jax.random.normal(k_x2, (N2, Ci2, H2, W2), dtype=jnp.float32).astype(jnp.bfloat16)
    w2 = jax.random.uniform(k_w2, (Ci2, Co2, 2, 2), dtype=jnp.float32,
                            minval=-bound2, maxval=bound2).astype(jnp.bfloat16)
    b2 = jax.random.uniform(k_b2, (Co2,), dtype=jnp.float32, minval=-bound2, maxval=bound2)
    out2 = jax.block_until_ready(upsample_block_transp_conv(x2, w2, b2))
    ref2 = _reference(x2.astype(jnp.float32), w2.astype(jnp.float32), b2)
    assert out2.shape == (N2, Co2, 2 * H2, 2 * W2), out2.shape
    assert jnp.allclose(out2.astype(jnp.float32), ref2, atol=2e-2, rtol=2e-2), "bf16 mismatch"

    # ---- Case 3: f32, N=1 (megacore row-split path), multiple row blocks ----
    N3, Ci3, Co3, H3, W3 = 1, 16, 8, 8, 32
    bound3 = (1.0 / (Ci3 * 2 * 2)) ** 0.5
    x3 = jax.random.normal(k_x3, (N3, Ci3, H3, W3), dtype=jnp.float32)
    w3 = jax.random.uniform(k_w3, (Ci3, Co3, 2, 2), dtype=jnp.float32,
                            minval=-bound3, maxval=bound3)
    b3 = jax.random.uniform(k_b3, (Co3,), dtype=jnp.float32, minval=-bound3, maxval=bound3)
    out3 = jax.block_until_ready(upsample_block_transp_conv(x3, w3, b3))
    ref3 = _reference(x3, w3, b3)
    assert out3.shape == (N3, Co3, 2 * H3, 2 * W3), out3.shape
    assert jnp.allclose(out3, ref3, atol=1e-5, rtol=1e-5), "f32 N=1 mismatch vs reference"

    print("KERNEL_OK")
</pallas_src>

<mosaic_0001>
module attributes {stable_mosaic.version = 11 : i64} {
  func.func @_transp_conv_fused_kernel(%arg0: i32, %arg1: i32, %arg2: memref<1x4x256xf32, #tpu.memory_space<vmem>>, %arg3: memref<16x4xf32, #tpu.memory_space<vmem>>, %arg4: memref<16x1xf32, #tpu.memory_space<vmem>>, %arg5: memref<2x16x32xf32, #tpu.memory_space<vmem>>, %arg6: memref<1x4x1024xf32, #tpu.memory_space<vmem>>) attributes {dimension_semantics = [#tpu.dimension_semantics<parallel>, #tpu.dimension_semantics<parallel>], iteration_bounds = array<i64: 2, 1>, scalar_prefetch = 0 : i64, scratch_operands = 0 : i64, tpu.core_type = #tpu.core_type<tc>, window_params = [{transform_indices = @transform_0, window_bounds = array<i64: 1, 4, 256>}, {pipeline_mode = #tpu.pipeline_mode<synchronous>, transform_indices = @transform_1, window_bounds = array<i64: 16, 4>}, {pipeline_mode = #tpu.pipeline_mode<synchronous>, transform_indices = @transform_2, window_bounds = array<i64: 16, 1>}, {pipeline_mode = #tpu.pipeline_mode<synchronous>, transform_indices = @transform_3, window_bounds = array<i64: 2, 16, 32>}, {transform_indices = @transform_4, window_bounds = array<i64: 1, 4, 1024>}]} {
    %c0 = arith.constant 0 : index
    %c0_0 = arith.constant 0 : index
    %0 = vector.load %arg3[%c0, %c0_0] : memref<16x4xf32, #tpu.memory_space<vmem>>, vector<16x4xf32>
    %c0_1 = arith.constant 0 : index
    %c0_2 = arith.constant 0 : index
    %c0_3 = arith.constant 0 : index
    %1 = vector.load %arg2[%c0_1, %c0_2, %c0_3] : memref<1x4x256xf32, #tpu.memory_space<vmem>>, vector<1x4x256xf32>
    %2 = vector.shape_cast %1 : vector<1x4x256xf32> to vector<4x256xf32>
    %cst = arith.constant dense<0.000000e+00> : vector<16x256xf32>
    %3 = tpu.matmul %0, %2, %cst {dimension_numbers = #tpu.dot_dimension_numbers<[1], [0], [0], [1], [0, 0, 1, 1], [], []>} : vector<16x4xf32>, vector<4x256xf32>, vector<16x256xf32> -> vector<16x256xf32>
    %c0_4 = arith.constant 0 : index
    %c0_5 = arith.constant 0 : index
    %4 = vector.load %arg4[%c0_4, %c0_5] : memref<16x1xf32, #tpu.memory_space<vmem>>, vector<16x1xf32>
    %5 = vector.broadcast %4 : vector<16x1xf32> to vector<16x256xf32>
    %6 = arith.addf %3, %5 : vector<16x256xf32>
    %c0_6 = arith.constant 0 : index
    %c0_7 = arith.constant 0 : index
    %c0_8 = arith.constant 0 : index
    %7 = vector.load %arg5[%c0_6, %c0_7, %c0_8] : memref<2x16x32xf32, #tpu.memory_space<vmem>>, vector<1x16x32xf32>
    %8 = vector.shape_cast %7 : vector<1x16x32xf32> to vector<16x32xf32>
    %c1 = arith.constant 1 : index
    %c0_9 = arith.constant 0 : index
    %c0_10 = arith.constant 0 : index
    %9 = vector.load %arg5[%c1, %c0_9, %c0_10] : memref<2x16x32xf32, #tpu.memory_space<vmem>>, vector<1x16x32xf32>
    %10 = vector.shape_cast %9 : vector<1x16x32xf32> to vector<16x32xf32>
    %11 = vector.extract_strided_slice %6 {offsets = [0, 0], sizes = [4, 256], strides = [1, 1]} : vector<16x256xf32> to vector<4x256xf32>
    %12 = vector.extract_strided_slice %6 {offsets = [4, 0], sizes = [4, 256], strides = [1, 1]} : vector<16x256xf32> to vector<4x256xf32>
    %13 = vector.extract_strided_slice %6 {offsets = [8, 0], sizes = [4, 256], strides = [1, 1]} : vector<16x256xf32> to vector<4x256xf32>
    %14 = vector.extract_strided_slice %6 {offsets = [12, 0], sizes = [4, 256], strides = [1, 1]} : vector<16x256xf32> to vector<4x256xf32>
    %15 = vector.extract_strided_slice %11 {offsets = [0, 0], sizes = [4, 16], strides = [1, 1]} : vector<4x256xf32> to vector<4x16xf32>
    %cst_11 = arith.constant dense<0.000000e+00> : vector<4x32xf32>
    %16 = tpu.matmul %15, %8, %cst_11 {dimension_numbers = #tpu.dot_dimension_numbers<[1], [0], [0], [1], [0, 0, 1, 1], [], []>} : vector<4x16xf32>, vector<16x32xf32>, vector<4x32xf32> -> vector<4x32xf32>
    %17 = vector.extract_strided_slice %12 {offsets = [0, 0], sizes = [4, 16], strides = [1, 1]} : vector<4x256xf32> to vector<4x16xf32>
    %cst_12 = arith.constant dense<0.000000e+00> : vector<4x32xf32>
    %18 = tpu.matmul %17, %10, %cst_12 {dimension_numbers = #tpu.dot_dimension_numbers<[1], [0], [0], [1], [0, 0, 1, 1], [], []>} : vector<4x16xf32>, vector<16x32xf32>, vector<4x32xf32> -> vector<4x32xf32>
    %19 = arith.addf %16, %18 : vector<4x32xf32>
    %c0_13 = arith.constant 0 : index
    %c0_14 = arith.constant 0 : index
    %c0_15 = arith.constant 0 : index
    %20 = vector.load %arg6[%c0_13, %c0_14, %c0_15] : memref<1x4x1024xf32, #tpu.memory_space<vmem>>, vector<1x4x32xf32>
    %21 = vector.shape_cast %20 : vector<1x4x32xf32> to vector<4x32xf32>
    %22 = vector.shape_cast %19 : vector<4x32xf32> to vector<1x4x32xf32>
    tpu.vector_store %arg6[%c0_13, %c0_14, %c0_15], %22 {strides = array<i32>} : memref<1x4x1024xf32, #tpu.memory_space<vmem>>, vector<1x4x32xf32>,
    %23 = vector.extract_strided_slice %13 {offsets = [0, 0], sizes = [4, 16], strides = [1, 1]} : vector<4x256xf32> to vector<4x16xf32>
    %cst_16 = arith.constant dense<0.000000e+00> : vector<4x32xf32>
    %24 = tpu.matmul %23, %8, %cst_16 {dimension_numbers = #tpu.dot_dimension_numbers<[1], [0], [0], [1], [0, 0, 1, 1], [], []>} : vector<4x16xf32>, vector<16x32xf32>, vector<4x32xf32> -> vector<4x32xf32>
    %25 = vector.extract_strided_slice %14 {offsets = [0, 0], sizes = [4, 16], strides = [1, 1]} : vector<4x256xf32> to vector<4x16xf32>
    %cst_17 = arith.constant dense<0.000000e+00> : vector<4x32xf32>
    %26 = tpu.matmul %25, %10, %cst_17 {dimension_numbers = #tpu.dot_dimension_numbers<[1], [0], [0], [1], [0, 0, 1, 1], [], []>} : vector<4x16xf32>, vector<16x32xf32>, vector<4x32xf32> -> vector<4x32xf32>
    %27 = arith.addf %24, %26 : vector<4x32xf32>
    %c0_18 = arith.constant 0 : index
    %c0_19 = arith.constant 0 : index
    %c32 = arith.constant 32 : index
    %28 = vector.load %arg6[%c0_18, %c0_19, %c32] : memref<1x4x1024xf32, #tpu.memory_space<vmem>>, vector<1x4x32xf32>
    %29 = vector.shape_cast %28 : vector<1x4x32xf32> to vector<4x32xf32>
    %30 = vector.shape_cast %27 : vector<4x32xf32> to vector<1x4x32xf32>
    tpu.vector_store %arg6[%c0_18, %c0_19, %c32], %30 {strides = array<i32>} : memref<1x4x1024xf32, #tpu.memory_space<vmem>>, vector<1x4x32xf32>,
    %31 = vector.extract_strided_slice %11 {offsets = [0, 16], sizes = [4, 16], strides = [1, 1]} : vector<4x256xf32> to vector<4x16xf32>
    %cst_20 = arith.constant dense<0.000000e+00> : vector<4x32xf32>
    %32 = tpu.matmul %31, %8, %cst_20 {dimension_numbers = #tpu.dot_dimension_numbers<[1], [0], [0], [1], [0, 0, 1, 1], [], []>} : vector<4x16xf32>, vector<16x32xf32>, vector<4x32xf32> -> vector<4x32xf32>
    %33 = vector.extract_strided_slice %12 {offsets = [0, 16], sizes = [4, 16], strides = [1, 1]} : vector<4x256xf32> to vector<4x16xf32>
    %cst_21 = arith.constant dense<0.000000e+00> : vector<4x32xf32>
    %34 = tpu.matmul %33, %10, %cst_21 {dimension_numbers = #tpu.dot_dimension_numbers<[1], [0], [0], [1], [0, 0, 1, 1], [], []>} : vector<4x16xf32>, vector<16x32xf32>, vector<4x32xf32> -> vector<4x32xf32>
    %35 = arith.addf %32, %34 : vector<4x32xf32>
    %c0_22 = arith.constant 0 : index
    %c0_23 = arith.constant 0 : index
    %c64 = arith.constant 64 : index
    %36 = vector.load %arg6[%c0_22, %c0_23, %c64] : memref<1x4x1024xf32, #tpu.memory_space<vmem>>, vector<1x4x32xf32>
    %37 = vector.shape_cast %36 : vector<1x4x32xf32> to vector<4x32xf32>
    %38 = vector.shape_cast %35 : vector<4x32xf32> to vector<1x4x32xf32>
    tpu.vector_store %arg6[%c0_22, %c0_23, %c64], %38 {strides = array<i32>} : memref<1x4x1024xf32, #tpu.memory_space<vmem>>, vector<1x4x32xf32>,
    %39 = vector.extract_strided_slice %13 {offsets = [0, 16], sizes = [4, 16], strides = [1, 1]} : vector<4x256xf32> to vector<4x16xf32>
    %cst_24 = arith.constant dense<0.000000e+00> : vector<4x32xf32>
    %40 = tpu.matmul %39, %8, %cst_24 {dimension_numbers = #tpu.dot_dimension_numbers<[1], [0], [0], [1], [0, 0, 1, 1], [], []>} : vector<4x16xf32>, vector<16x32xf32>, vector<4x32xf32> -> vector<4x32xf32>
    %41 = vector.extract_strided_slice %14 {offsets = [0, 16], sizes = [4, 16], strides = [1, 1]} : vector<4x256xf32> to vector<4x16xf32>
    %cst_25 = arith.constant dense<0.000000e+00> : vector<4x32xf32>
    %42 = tpu.matmul %41, %10, %cst_25 {dimension_numbers = #tpu.dot_dimension_numbers<[1], [0], [0], [1], [0, 0, 1, 1], [], []>} : vector<4x16xf32>, vector<16x32xf32>, vector<4x32xf32> -> vector<4x32xf32>
    %43 = arith.addf %40, %42 : vector<4x32xf32>
    %c0_26 = arith.constant 0 : index
    %c0_27 = arith.constant 0 : index
    %c96 = arith.constant 96 : index
    %44 = vector.load %arg6[%c0_26, %c0_27, %c96] : memref<1x4x1024xf32, #tpu.memory_space<vmem>>, vector<1x4x32xf32>
    %45 = vector.shape_cast %44 : vector<1x4x32xf32> to vector<4x32xf32>
    %46 = vector.shape_cast %43 : vector<4x32xf32> to vector<1x4x32xf32>
    tpu.vector_store %arg6[%c0_26, %c0_27, %c96], %46 {strides = array<i32>} : memref<1x4x1024xf32, #tpu.memory_space<vmem>>, vector<1x4x32xf32>,
    %47 = vector.extract_strided_slice %11 {offsets = [0, 32], sizes = [4, 16], strides = [1, 1]} : vector<4x256xf32> to vector<4x16xf32>
    %cst_28 = arith.constant dense<0.000000e+00> : vector<4x32xf32>
    %48 = tpu.matmul %47, %8, %cst_28 {dimension_numbers = #tpu.dot_dimension_numbers<[1], [0], [0], [1], [0, 0, 1, 1], [], []>} : vector<4x16xf32>, vector<16x32xf32>, vector<4x32xf32> -> vector<4x32xf32>
    %49 = vector.extract_strided_slice %12 {offsets = [0, 32], sizes = [4, 16], strides = [1, 1]} : vector<4x256xf32> to vector<4x16xf32>
    %cst_29 = arith.constant dense<0.000000e+00> : vector<4x32xf32>
    %50 = tpu.matmul %49, %10, %cst_29 {dimension_numbers = #tpu.dot_dimension_numbers<[1], [0], [0], [1], [0, 0, 1, 1], [], []>} : vector<4x16xf32>, vector<16x32xf32>, vector<4x32xf32> -> vector<4x32xf32>
    %51 = arith.addf %48, %50 : vector<4x32xf32>
    %c0_30 = arith.constant 0 : index
    %c0_31 = arith.constant 0 : index
    %c128 = arith.constant 128 : index
    %52 = vector.load %arg6[%c0_30, %c0_31, %c128] : memref<1x4x1024xf32, #tpu.memory_space<vmem>>, vector<1x4x32xf32>
    %53 = vector.shape_cast %52 : vector<1x4x32xf32> to vector<4x32xf32>
    %54 = vector.shape_cast %51 : vector<4x32xf32> to vector<1x4x32xf32>
    tpu.vector_store %arg6[%c0_30, %c0_31, %c128], %54 {strides = array<i32>} : memref<1x4x1024xf32, #tpu.memory_space<vmem>>, vector<1x4x32xf32>,
    %55 = vector.extract_strided_slice %13 {offsets = [0, 32], sizes = [4, 16], strides = [1, 1]} : vector<4x256xf32> to vector<4x16xf32>
    %cst_32 = arith.constant dense<0.000000e+00> : vector<4x32xf32>
    %56 = tpu.matmul %55, %8, %cst_32 {dimension_numbers = #tpu.dot_dimension_numbers<[1], [0], [0], [1], [0, 0, 1, 1], [], []>} : vector<4x16xf32>, vector<16x32xf32>, vector<4x32xf32> -> vector<4x32xf32>
    %57 = vector.extract_strided_slice %14 {offsets = [0, 32], sizes = [4, 16], strides = [1, 1]} : vector<4x256xf32> to vector<4x16xf32>
    %cst_33 = arith.constant dense<0.000000e+00> : vector<4x32xf32>
    %58 = tpu.matmul %57, %10, %cst_33 {dimension_numbers = #tpu.dot_dimension_numbers<[1], [0], [0], [1], [0, 0, 1, 1], [], []>} : vector<4x16xf32>, vector<16x32xf32>, vector<4x32xf32> -> vector<4x32xf32>
    %59 = arith.addf %56, %58 : vector<4x32xf32>
    %c0_34 = arith.constant 0 : index
    %c0_35 = arith.constant 0 : index
    %c160 = arith.constant 160 : index
    %60 = vector.load %arg6[%c0_34, %c0_35, %c160] : memref<1x4x1024xf32, #tpu.memory_space<vmem>>, vector<1x4x32xf32>
    %61 = vector.shape_cast %60 : vector<1x4x32xf32> to vector<4x32xf32>
    %62 = vector.shape_cast %59 : vector<4x32xf32> to vector<1x4x32xf32>
    tpu.vector_store %arg6[%c0_34, %c0_35, %c160], %62 {strides = array<i32>} : memref<1x4x1024xf32, #tpu.memory_space<vmem>>, vector<1x4x32xf32>,
    %63 = vector.extract_strided_slice %11 {offsets = [0, 48], sizes = [4, 16], strides = [1, 1]} : vector<4x256xf32> to vector<4x16xf32>
    %cst_36 = arith.constant dense<0.000000e+00> : vector<4x32xf32>
    %64 = tpu.matmul %63, %8, %cst_36 {dimension_numbers = #tpu.dot_dimension_numbers<[1], [0], [0], [1], [0, 0, 1, 1], [], []>} : vector<4x16xf32>, vector<16x32xf32>, vector<4x32xf32> -> vector<4x32xf32>
    %65 = vector.extract_strided_slice %12 {offsets = [0, 48], sizes = [4, 16], strides = [1, 1]} : vector<4x256xf32> to vector<4x16xf32>
    %cst_37 = arith.constant dense<0.000000e+00> : vector<4x32xf32>
    %66 = tpu.matmul %65, %10, %cst_37 {dimension_numbers = #tpu.dot_dimension_numbers<[1], [0], [0], [1], [0, 0, 1, 1], [], []>} : vector<4x16xf32>, vector<16x32xf32>, vector<4x32xf32> -> vector<4x32xf32>
    %67 = arith.addf %64, %66 : vector<4x32xf32>
    %c0_38 = arith.constant 0 : index
    %c0_39 = arith.constant 0 : index
    %c192 = arith.constant 192 : index
    %68 = vector.load %arg6[%c0_38, %c0_39, %c192] : memref<1x4x1024xf32, #tpu.memory_space<vmem>>, vector<1x4x32xf32>
    %69 = vector.shape_cast %68 : vector<1x4x32xf32> to vector<4x32xf32>
    %70 = vector.shape_cast %67 : vector<4x32xf32> to vector<1x4x32xf32>
    tpu.vector_store %arg6[%c0_38, %c0_39, %c192], %70 {strides = array<i32>} : memref<1x4x1024xf32, #tpu.memory_space<vmem>>, vector<1x4x32xf32>,
    %71 = vector.extract_strided_slice %13 {offsets = [0, 48], sizes = [4, 16], strides = [1, 1]} : vector<4x256xf32> to vector<4x16xf32>
    %cst_40 = arith.constant dense<0.000000e+00> : vector<4x32xf32>
    %72 = tpu.matmul %71, %8, %cst_40 {dimension_numbers = #tpu.dot_dimension_numbers<[1], [0], [0], [1], [0, 0, 1, 1], [], []>} : vector<4x16xf32>, vector<16x32xf32>, vector<4x32xf32> -> vector<4x32xf32>
    %73 = vector.extract_strided_slice %14 {offsets = [0, 48], sizes = [4, 16], strides = [1, 1]} : vector<4x256xf32> to vector<4x16xf32>
    %cst_41 = arith.constant dense<0.000000e+00> : vector<4x32xf32>
    %74 = tpu.matmul %73, %10, %cst_41 {dimension_numbers = #tpu.dot_dimension_numbers<[1], [0], [0], [1], [0, 0, 1, 1], [], []>} : vector<4x16xf32>, vector<16x32xf32>, vector<4x32xf32> -> vector<4x32xf32>
    %75 = arith.addf %72, %74 : vector<4x32xf32>
    %c0_42 = arith.constant 0 : index
    %c0_43 = arith.constant 0 : index
    %c224 = arith.constant 224 : index
    %76 = vector.load %arg6[%c0_42, %c0_43, %c224] : memref<1x4x1024xf32, #tpu.memory_space<vmem>>, vector<1x4x32xf32>
    %77 = vector.shape_cast %76 : vector<1x4x32xf32> to vector<4x32xf32>
    %78 = vector.shape_cast %75 : vector<4x32xf32> to vector<1x4x32xf32>
    tpu.vector_store %arg6[%c0_42, %c0_43, %c224], %78 {strides = array<i32>} : memref<1x4x1024xf32, #tpu.memory_space<vmem>>, vector<1x4x32xf32>,
    %79 = vector.extract_strided_slice %11 {offsets = [0, 64], sizes = [4, 16], strides = [1, 1]} : vector<4x256xf32> to vector<4x16xf32>
    %cst_44 = arith.constant dense<0.000000e+00> : vector<4x32xf32>
    %80 = tpu.matmul %79, %8, %cst_44 {dimension_numbers = #tpu.dot_dimension_numbers<[1], [0], [0], [1], [0, 0, 1, 1], [], []>} : vector<4x16xf32>, vector<16x32xf32>, vector<4x32xf32> -> vector<4x32xf32>
    %81 = vector.extract_strided_slice %12 {offsets = [0, 64], sizes = [4, 16], strides = [1, 1]} : vector<4x256xf32> to vector<4x16xf32>
    %cst_45 = arith.constant dense<0.000000e+00> : vector<4x32xf32>
    %82 = tpu.matmul %81, %10, %cst_45 {dimension_numbers = #tpu.dot_dimension_numbers<[1], [0], [0], [1], [0, 0, 1, 1], [], []>} : vector<4x16xf32>, vector<16x32xf32>, vector<4x32xf32> -> vector<4x32xf32>
    %83 = arith.addf %80, %82 : vector<4x32xf32>
    %c0_46 = arith.constant 0 : index
    %c0_47 = arith.constant 0 : index
    %c256 = arith.constant 256 : index
    %84 = vector.load %arg6[%c0_46, %c0_47, %c256] : memref<1x4x1024xf32, #tpu.memory_space<vmem>>, vector<1x4x32xf32>
    %85 = vector.shape_cast %84 : vector<1x4x32xf32> to vector<4x32xf32>
    %86 = vector.shape_cast %83 : vector<4x32xf32> to vector<1x4x32xf32>
    tpu.vector_store %arg6[%c0_46, %c0_47, %c256], %86 {strides = array<i32>} : memref<1x4x1024xf32, #tpu.memory_space<vmem>>, vector<1x4x32xf32>,
    %87 = vector.extract_strided_slice %13 {offsets = [0, 64], sizes = [4, 16], strides = [1, 1]} : vector<4x256xf32> to vector<4x16xf32>
    %cst_48 = arith.constant dense<0.000000e+00> : vector<4x32xf32>
    %88 = tpu.matmul %87, %8, %cst_48 {dimension_numbers = #tpu.dot_dimension_numbers<[1], [0], [0], [1], [0, 0, 1, 1], [], []>} : vector<4x16xf32>, vector<16x32xf32>, vector<4x32xf32> -> vector<4x32xf32>
    %89 = vector.extract_strided_slice %14 {offsets = [0, 64], sizes = [4, 16], strides = [1, 1]} : vector<4x256xf32> to vector<4x16xf32>
    %cst_49 = arith.constant dense<0.000000e+00> : vector<4x32xf32>
    %90 = tpu.matmul %89, %10, %cst_49 {dimension_numbers = #tpu.dot_dimension_numbers<[1], [0], [0], [1], [0, 0, 1, 1], [], []>} : vector<4x16xf32>, vector<16x32xf32>, vector<4x32xf32> -> vector<4x32xf32>
    %91 = arith.addf %88, %90 : vector<4x32xf32>
    %c0_50 = arith.constant 0 : index
    %c0_51 = arith.constant 0 : index
    %c288 = arith.constant 288 : index
    %92 = vector.load %arg6[%c0_50, %c0_51, %c288] : memref<1x4x1024xf32, #tpu.memory_space<vmem>>, vector<1x4x32xf32>
    %93 = vector.shape_cast %92 : vector<1x4x32xf32> to vector<4x32xf32>
    %94 = vector.shape_cast %91 : vector<4x32xf32> to vector<1x4x32xf32>
    tpu.vector_store %arg6[%c0_50, %c0_51, %c288], %94 {strides = array<i32>} : memref<1x4x1024xf32, #tpu.memory_space<vmem>>, vector<1x4x32xf32>,
    %95 = vector.extract_strided_slice %11 {offsets = [0, 80], sizes = [4, 16], strides = [1, 1]} : vector<4x256xf32> to vector<4x16xf32>
    %cst_52 = arith.constant dense<0.000000e+00> : vector<4x32xf32>
    %96 = tpu.matmul %95, %8, %cst_52 {dimension_numbers = #tpu.dot_dimension_numbers<[1], [0], [0], [1], [0, 0, 1, 1], [], []>} : vector<4x16xf32>, vector<16x32xf32>, vector<4x32xf32> -> vector<4x32xf32>
    %97 = vector.extract_strided_slice %12 {offsets = [0, 80], sizes = [4, 16], strides = [1, 1]} : vector<4x256xf32> to vector<4x16xf32>
    %cst_53 = arith.constant dense<0.000000e+00> : vector<4x32xf32>
    %98 = tpu.matmul %97, %10, %cst_53 {dimension_numbers = #tpu.dot_dimension_numbers<[1], [0], [0], [1], [0, 0, 1, 1], [], []>} : vector<4x16xf32>, vector<16x32xf32>, vector<4x32xf32> -> vector<4x32xf32>
    %99 = arith.addf %96, %98 : vector<4x32xf32>
    %c0_54 = arith.constant 0 : index
    %c0_55 = arith.constant 0 : index
    %c320 = arith.constant 320 : index
    %100 = vector.load %arg6[%c0_54, %c0_55, %c320] : memref<1x4x1024xf32, #tpu.memory_space<vmem>>, vector<1x4x32xf32>
    %101 = vector.shape_cast %100 : vector<1x4x32xf32> to vector<4x32xf32>
    %102 = vector.shape_cast %99 : vector<4x32xf32> to vector<1x4x32xf32>
    tpu.vector_store %arg6[%c0_54, %c0_55, %c320], %102 {strides = array<i32>} : memref<1x4x1024xf32, #tpu.memory_space<vmem>>, vector<1x4x32xf32>,
    %103 = vector.extract_strided_slice %13 {offsets = [0, 80], sizes = [4, 16], strides = [1, 1]} : vector<4x256xf32> to vector<4x16xf32>
    %cst_56 = arith.constant dense<0.000000e+00> : vector<4x32xf32>
    %104 = tpu.matmul %103, %8, %cst_56 {dimension_numbers = #tpu.dot_dimension_numbers<[1], [0], [0], [1], [0, 0, 1, 1], [], []>} : vector<4x16xf32>, vector<16x32xf32>, vector<4x32xf32> -> vector<4x32xf32>
    %105 = vector.extract_strided_slice %14 {offsets = [0, 80], sizes = [4, 16], strides = [1, 1]} : vector<4x256xf32> to vector<4x16xf32>
    %cst_57 = arith.constant dense<0.000000e+00> : vector<4x32xf32>
    %106 = tpu.matmul %105, %10, %cst_57 {dimension_numbers = #tpu.dot_dimension_numbers<[1], [0], [0], [1], [0, 0, 1, 1], [], []>} : vector<4x16xf32>, vector<16x32xf32>, vector<4x32xf32> -> vector<4x32xf32>
    %107 = arith.addf %104, %106 : vector<4x32xf32>
    %c0_58 = arith.constant 0 : index
    %c0_59 = arith.constant 0 : index
    %c352 = arith.constant 352 : index
    %108 = vector.load %arg6[%c0_58, %c0_59, %c352] : memref<1x4x1024xf32, #tpu.memory_space<vmem>>, vector<1x4x32xf32>
    %109 = vector.shape_cast %108 : vector<1x4x32xf32> to vector<4x32xf32>
    %110 = vector.shape_cast %107 : vector<4x32xf32> to vector<1x4x32xf32>
    tpu.vector_store %arg6[%c0_58, %c0_59, %c352], %110 {strides = array<i32>} : memref<1x4x1024xf32, #tpu.memory_space<vmem>>, vector<1x4x32xf32>,
    %111 = vector.extract_strided_slice %11 {offsets = [0, 96], sizes = [4, 16], strides = [1, 1]} : vector<4x256xf32> to vector<4x16xf32>
    %cst_60 = arith.constant dense<0.000000e+00> : vector<4x32xf32>
    %112 = tpu.matmul %111, %8, %cst_60 {dimension_numbers = #tpu.dot_dimension_numbers<[1], [0], [0], [1], [0, 0, 1, 1], [], []>} : vector<4x16xf32>, vector<16x32xf32>, vector<4x32xf32> -> vector<4x32xf32>
    %113 = vector.extract_strided_slice %12 {offsets = [0, 96], sizes = [4, 16], strides = [1, 1]} : vector<4x256xf32> to vector<4x16xf32>
    %cst_61 = arith.constant dense<0.000000e+00> : vector<4x32xf32>
    %114 = tpu.matmul %113, %10, %cst_61 {dimension_numbers = #tpu.dot_dimension_numbers<[1], [0], [0], [1], [0, 0, 1, 1], [], []>} : vector<4x16xf32>, vector<16x32xf32>, vector<4x32xf32> -> vector<4x32xf32>
    %115 = arith.addf %112, %114 : vector<4x32xf32>
    %c0_62 = arith.constant 0 : index
    %c0_63 = arith.constant 0 : index
    %c384 = arith.constant 384 : index
    %116 = vector.load %arg6[%c0_62, %c0_63, %c384] : memref<1x4x1024xf32, #tpu.memory_space<vmem>>, vector<1x4x32xf32>
    %117 = vector.shape_cast %116 : vector<1x4x32xf32> to vector<4x32xf32>
    %118 = vector.shape_cast %115 : vector<4x32xf32> to vector<1x4x32xf32>
    tpu.vector_store %arg6[%c0_62, %c0_63, %c384], %118 {strides = array<i32>} : memref<1x4x1024xf32, #tpu.memory_space<vmem>>, vector<1x4x32xf32>,
    %119 = vector.extract_strided_slice %13 {offsets = [0, 96], sizes = [4, 16], strides = [1, 1]} : vector<4x256xf32> to vector<4x16xf32>
    %cst_64 = arith.constant dense<0.000000e+00> : vector<4x32xf32>
    %120 = tpu.matmul %119, %8, %cst_64 {dimension_numbers = #tpu.dot_dimension_numbers<[1], [0], [0], [1], [0, 0, 1, 1], [], []>} : vector<4x16xf32>, vector<16x32xf32>, vector<4x32xf32> -> vector<4x32xf32>
    %121 = vector.extract_strided_slice %14 {offsets = [0, 96], sizes = [4, 16], strides = [1, 1]} : vector<4x256xf32> to vector<4x16xf32>
    %cst_65 = arith.constant dense<0.000000e+00> : vector<4x32xf32>
    %122 = tpu.matmul %121, %10, %cst_65 {dimension_numbers = #tpu.dot_dimension_numbers<[1], [0], [0], [1], [0, 0, 1, 1], [], []>} : vector<4x16xf32>, vector<16x32xf32>, vector<4x32xf32> -> vector<4x32xf32>
    %123 = arith.addf %120, %122 : vector<4x32xf32>
    %c0_66 = arith.constant 0 : index
    %c0_67 = arith.constant 0 : index
    %c416 = arith.constant 416 : index
    %124 = vector.load %arg6[%c0_66, %c0_67, %c416] : memref<1x4x1024xf32, #tpu.memory_space<vmem>>, vector<1x4x32xf32>
    %125 = vector.shape_cast %124 : vector<1x4x32xf32> to vector<4x32xf32>
    %126 = vector.shape_cast %123 : vector<4x32xf32> to vector<1x4x32xf32>
    tpu.vector_store %arg6[%c0_66, %c0_67, %c416], %126 {strides = array<i32>} : memref<1x4x1024xf32, #tpu.memory_space<vmem>>, vector<1x4x32xf32>,
    %127 = vector.extract_strided_slice %11 {offsets = [0, 112], sizes = [4, 16], strides = [1, 1]} : vector<4x256xf32> to vector<4x16xf32>
    %cst_68 = arith.constant dense<0.000000e+00> : vector<4x32xf32>
    %128 = tpu.matmul %127, %8, %cst_68 {dimension_numbers = #tpu.dot_dimension_numbers<[1], [0], [0], [1], [0, 0, 1, 1], [], []>} : vector<4x16xf32>, vector<16x32xf32>, vector<4x32xf32> -> vector<4x32xf32>
    %129 = vector.extract_strided_slice %12 {offsets = [0, 112], sizes = [4, 16], strides = [1, 1]} : vector<4x256xf32> to vector<4x16xf32>
    %cst_69 = arith.constant dense<0.000000e+00> : vector<4x32xf32>
    %130 = tpu.matmul %129, %10, %cst_69 {dimension_numbers = #tpu.dot_dimension_numbers<[1], [0], [0], [1], [0, 0, 1, 1], [], []>} : vector<4x16xf32>, vector<16x32xf32>, vector<4x32xf32> -> vector<4x32xf32>
    %131 = arith.addf %128, %130 : vector<4x32xf32>
    %c0_70 = arith.constant 0 : index
    %c0_71 = arith.constant 0 : index
    %c448 = arith.constant 448 : index
    %132 = vector.load %arg6[%c0_70, %c0_71, %c448] : memref<1x4x1024xf32, #tpu.memory_space<vmem>>, vector<1x4x32xf32>
    %133 = vector.shape_cast %132 : vector<1x4x32xf32> to vector<4x32xf32>
    %134 = vector.shape_cast %131 : vector<4x32xf32> to vector<1x4x32xf32>
    tpu.vector_store %arg6[%c0_70, %c0_71, %c448], %134 {strides = array<i32>} : memref<1x4x1024xf32, #tpu.memory_space<vmem>>, vector<1x4x32xf32>,
    %135 = vector.extract_strided_slice %13 {offsets = [0, 112], sizes = [4, 16], strides = [1, 1]} : vector<4x256xf32> to vector<4x16xf32>
    %cst_72 = arith.constant dense<0.000000e+00> : vector<4x32xf32>
    %136 = tpu.matmul %135, %8, %cst_72 {dimension_numbers = #tpu.dot_dimension_numbers<[1], [0], [0], [1], [0, 0, 1, 1], [], []>} : vector<4x16xf32>, vector<16x32xf32>, vector<4x32xf32> -> vector<4x32xf32>
    %137 = vector.extract_strided_slice %14 {offsets = [0, 112], sizes = [4, 16], strides = [1, 1]} : vector<4x256xf32> to vector<4x16xf32>
    %cst_73 = arith.constant dense<0.000000e+00> : vector<4x32xf32>
    %138 = tpu.matmul %137, %10, %cst_73 {dimension_numbers = #tpu.dot_dimension_numbers<[1], [0], [0], [1], [0, 0, 1, 1], [], []>} : vector<4x16xf32>, vector<16x32xf32>, vector<4x32xf32> -> vector<4x32xf32>
    %139 = arith.addf %136, %138 : vector<4x32xf32>
    %c0_74 = arith.constant 0 : index
    %c0_75 = arith.constant 0 : index
    %c480 = arith.constant 480 : index
    %140 = vector.load %arg6[%c0_74, %c0_75, %c480] : memref<1x4x1024xf32, #tpu.memory_space<vmem>>, vector<1x4x32xf32>
    %141 = vector.shape_cast %140 : vector<1x4x32xf32> to vector<4x32xf32>
    %142 = vector.shape_cast %139 : vector<4x32xf32> to vector<1x4x32xf32>
    tpu.vector_store %arg6[%c0_74, %c0_75, %c480], %142 {strides = array<i32>} : memref<1x4x1024xf32, #tpu.memory_space<vmem>>, vector<1x4x32xf32>,
    %143 = vector.extract_strided_slice %11 {offsets = [0, 128], sizes = [4, 16], strides = [1, 1]} : vector<4x256xf32> to vector<4x16xf32>
    %cst_76 = arith.constant dense<0.000000e+00> : vector<4x32xf32>
    %144 = tpu.matmul %143, %8, %cst_76 {dimension_numbers = #tpu.dot_dimension_numbers<[1], [0], [0], [1], [0, 0, 1, 1], [], []>} : vector<4x16xf32>, vector<16x32xf32>, vector<4x32xf32> -> vector<4x32xf32>
    %145 = vector.extract_strided_slice %12 {offsets = [0, 128], sizes = [4, 16], strides = [1, 1]} : vector<4x256xf32> to vector<4x16xf32>
    %cst_77 = arith.constant dense<0.000000e+00> : vector<4x32xf32>
    %146 = tpu.matmul %145, %10, %cst_77 {dimension_numbers = #tpu.dot_dimension_numbers<[1], [0], [0], [1], [0, 0, 1, 1], [], []>} : vector<4x16xf32>, vector<16x32xf32>, vector<4x32xf32> -> vector<4x32xf32>
    %147 = arith.addf %144, %146 : vector<4x32xf32>
    %c0_78 = arith.constant 0 : index
    %c0_79 = arith.constant 0 : index
    %c512 = arith.constant 512 : index
    %148 = vector.load %arg6[%c0_78, %c0_79, %c512] : memref<1x4x1024xf32, #tpu.memory_space<vmem>>, vector<1x4x32xf32>
    %149 = vector.shape_cast %148 : vector<1x4x32xf32> to vector<4x32xf32>
    %150 = vector.shape_cast %147 : vector<4x32xf32> to vector<1x4x32xf32>
    tpu.vector_store %arg6[%c0_78, %c0_79, %c512], %150 {strides = array<i32>} : memref<1x4x1024xf32, #tpu.memory_space<vmem>>, vector<1x4x32xf32>,
    %151 = vector.extract_strided_slice %13 {offsets = [0, 128], sizes = [4, 16], strides = [1, 1]} : vector<4x256xf32> to vector<4x16xf32>
    %cst_80 = arith.constant dense<0.000000e+00> : vector<4x32xf32>
    %152 = tpu.matmul %151, %8, %cst_80 {dimension_numbers = #tpu.dot_dimension_numbers<[1], [0], [0], [1], [0, 0, 1, 1], [], []>} : vector<4x16xf32>, vector<16x32xf32>, vector<4x32xf32> -> vector<4x32xf32>
    %153 = vector.extract_strided_slice %14 {offsets = [0, 128], sizes = [4, 16], strides = [1, 1]} : vector<4x256xf32> to vector<4x16xf32>
    %cst_81 = arith.constant dense<0.000000e+00> : vector<4x32xf32>
    %154 = tpu.matmul %153, %10, %cst_81 {dimension_numbers = #tpu.dot_dimension_numbers<[1], [0], [0], [1], [0, 0, 1, 1], [], []>} : vector<4x16xf32>, vector<16x32xf32>, vector<4x32xf32> -> vector<4x32xf32>
    %155 = arith.addf %152, %154 : vector<4x32xf32>
    %c0_82 = arith.constant 0 : index
    %c0_83 = arith.constant 0 : index
    %c544 = arith.constant 544 : index
    %156 = vector.load %arg6[%c0_82, %c0_83, %c544] : memref<1x4x1024xf32, #tpu.memory_space<vmem>>, vector<1x4x32xf32>
    %157 = vector.shape_cast %156 : vector<1x4x32xf32> to vector<4x32xf32>
    %158 = vector.shape_cast %155 : vector<4x32xf32> to vector<1x4x32xf32>
    tpu.vector_store %arg6[%c0_82, %c0_83, %c544], %158 {strides = array<i32>} : memref<1x4x1024xf32, #tpu.memory_space<vmem>>, vector<1x4x32xf32>,
    %159 = vector.extract_strided_slice %11 {offsets = [0, 144], sizes = [4, 16], strides = [1, 1]} : vector<4x256xf32> to vector<4x16xf32>
    %cst_84 = arith.constant dense<0.000000e+00> : vector<4x32xf32>
    %160 = tpu.matmul %159, %8, %cst_84 {dimension_numbers = #tpu.dot_dimension_numbers<[1], [0], [0], [1], [0, 0, 1, 1], [], []>} : vector<4x16xf32>, vector<16x32xf32>, vector<4x32xf32> -> vector<4x32xf32>
    %161 = vector.extract_strided_slice %12 {offsets = [0, 144], sizes = [4, 16], strides = [1, 1]} : vector<4x256xf32> to vector<4x16xf32>
    %cst_85 = arith.constant dense<0.000000e+00> : vector<4x32xf32>
    %162 = tpu.matmul %161, %10, %cst_85 {dimension_numbers = #tpu.dot_dimension_numbers<[1], [0], [0], [1], [0, 0, 1, 1], [], []>} : vector<4x16xf32>, vector<16x32xf32>, vector<4x32xf32> -> vector<4x32xf32>
    %163 = arith.addf %160, %162 : vector<4x32xf32>
    %c0_86 = arith.constant 0 : index
    %c0_87 = arith.constant 0 : index
    %c576 = arith.constant 576 : index
    %164 = vector.load %arg6[%c0_86, %c0_87, %c576] : memref<1x4x1024xf32, #tpu.memory_space<vmem>>, vector<1x4x32xf32>
    %165 = vector.shape_cast %164 : vector<1x4x32xf32> to vector<4x32xf32>
    %166 = vector.shape_cast %163 : vector<4x32xf32> to vector<1x4x32xf32>
    tpu.vector_store %arg6[%c0_86, %c0_87, %c576], %166 {strides = array<i32>} : memref<1x4x1024xf32, #tpu.memory_space<vmem>>, vector<1x4x32xf32>,
    %167 = vector.extract_strided_slice %13 {offsets = [0, 144], sizes = [4, 16], strides = [1, 1]} : vector<4x256xf32> to vector<4x16xf32>
    %cst_88 = arith.constant dense<0.000000e+00> : vector<4x32xf32>
    %168 = tpu.matmul %167, %8, %cst_88 {dimension_numbers = #tpu.dot_dimension_numbers<[1], [0], [0], [1], [0, 0, 1, 1], [], []>} : vector<4x16xf32>, vector<16x32xf32>, vector<4x32xf32> -> vector<4x32xf32>
    %169 = vector.extract_strided_slice %14 {offsets = [0, 144], sizes = [4, 16], strides = [1, 1]} : vector<4x256xf32> to vector<4x16xf32>
    %cst_89 = arith.constant dense<0.000000e+00> : vector<4x32xf32>
    %170 = tpu.matmul %169, %10, %cst_89 {dimension_numbers = #tpu.dot_dimension_numbers<[1], [0], [0], [1], [0, 0, 1, 1], [], []>} : vector<4x16xf32>, vector<16x32xf32>, vector<4x32xf32> -> vector<4x32xf32>
    %171 = arith.addf %168, %170 : vector<4x32xf32>
    %c0_90 = arith.constant 0 : index
    %c0_91 = arith.constant 0 : index
    %c608 = arith.constant 608 : index
    %172 = vector.load %arg6[%c0_90, %c0_91, %c608] : memref<1x4x1024xf32, #tpu.memory_space<vmem>>, vector<1x4x32xf32>
    %173 = vector.shape_cast %172 : vector<1x4x32xf32> to vector<4x32xf32>
    %174 = vector.shape_cast %171 : vector<4x32xf32> to vector<1x4x32xf32>
    tpu.vector_store %arg6[%c0_90, %c0_91, %c608], %174 {strides = array<i32>} : memref<1x4x1024xf32, #tpu.memory_space<vmem>>, vector<1x4x32xf32>,
    %175 = vector.extract_strided_slice %11 {offsets = [0, 160], sizes = [4, 16], strides = [1, 1]} : vector<4x256xf32> to vector<4x16xf32>
    %cst_92 = arith.constant dense<0.000000e+00> : vector<4x32xf32>
    %176 = tpu.matmul %175, %8, %cst_92 {dimension_numbers = #tpu.dot_dimension_numbers<[1], [0], [0], [1], [0, 0, 1, 1], [], []>} : vector<4x16xf32>, vector<16x32xf32>, vector<4x32xf32> -> vector<4x32xf32>
    %177 = vector.extract_strided_slice %12 {offsets = [0, 160], sizes = [4, 16], strides = [1, 1]} : vector<4x256xf32> to vector<4x16xf32>
    %cst_93 = arith.constant dense<0.000000e+00> : vector<4x32xf32>
    %178 = tpu.matmul %177, %10, %cst_93 {dimension_numbers = #tpu.dot_dimension_numbers<[1], [0], [0], [1], [0, 0, 1, 1], [], []>} : vector<4x16xf32>, vector<16x32xf32>, vector<4x32xf32> -> vector<4x32xf32>
    %179 = arith.addf %176, %178 : vector<4x32xf32>
    %c0_94 = arith.constant 0 : index
    %c0_95 = arith.constant 0 : index
    %c640 = arith.constant 640 : index
    %180 = vector.load %arg6[%c0_94, %c0_95, %c640] : memref<1x4x1024xf32, #tpu.memory_space<vmem>>, vector<1x4x32xf32>
    %181 = vector.shape_cast %180 : vector<1x4x32xf32> to vector<4x32xf32>
    %182 = vector.shape_cast %179 : vector<4x32xf32> to vector<1x4x32xf32>
    tpu.vector_store %arg6[%c0_94, %c0_95, %c640], %182 {strides = array<i32>} : memref<1x4x1024xf32, #tpu.memory_space<vmem>>, vector<1x4x32xf32>,
    %183 = vector.extract_strided_slice %13 {offsets = [0, 160], sizes = [4, 16], strides = [1, 1]} : vector<4x256xf32> to vector<4x16xf32>
    %cst_96 = arith.constant dense<0.000000e+00> : vector<4x32xf32>
    %184 = tpu.matmul %183, %8, %cst_96 {dimension_numbers = #tpu.dot_dimension_numbers<[1], [0], [0], [1], [0, 0, 1, 1], [], []>} : vector<4x16xf32>, vector<16x32xf32>, vector<4x32xf32> -> vector<4x32xf32>
    %185 = vector.extract_strided_slice %14 {offsets = [0, 160], sizes = [4, 16], strides = [1, 1]} : vector<4x256xf32> to vector<4x16xf32>
    %cst_97 = arith.constant dense<0.000000e+00> : vector<4x32xf32>
    %186 = tpu.matmul %185, %10, %cst_97 {dimension_numbers = #tpu.dot_dimension_numbers<[1], [0], [0], [1], [0, 0, 1, 1], [], []>} : vector<4x16xf32>, vector<16x32xf32>, vector<4x32xf32> -> vector<4x32xf32>
    %187 = arith.addf %184, %186 : vector<4x32xf32>
    %c0_98 = arith.constant 0 : index
    %c0_99 = arith.constant 0 : index
    %c672 = arith.constant 672 : index
    %188 = vector.load %arg6[%c0_98, %c0_99, %c672] : memref<1x4x1024xf32, #tpu.memory_space<vmem>>, vector<1x4x32xf32>
    %189 = vector.shape_cast %188 : vector<1x4x32xf32> to vector<4x32xf32>
    %190 = vector.shape_cast %187 : vector<4x32xf32> to vector<1x4x32xf32>
    tpu.vector_store %arg6[%c0_98, %c0_99, %c672], %190 {strides = array<i32>} : memref<1x4x1024xf32, #tpu.memory_space<vmem>>, vector<1x4x32xf32>,
    %191 = vector.extract_strided_slice %11 {offsets = [0, 176], sizes = [4, 16], strides = [1, 1]} : vector<4x256xf32> to vector<4x16xf32>
    %cst_100 = arith.constant dense<0.000000e+00> : vector<4x32xf32>
    %192 = tpu.matmul %191, %8, %cst_100 {dimension_numbers = #tpu.dot_dimension_numbers<[1], [0], [0], [1], [0, 0, 1, 1], [], []>} : vector<4x16xf32>, vector<16x32xf32>, vector<4x32xf32> -> vector<4x32xf32>
    %193 = vector.extract_strided_slice %12 {offsets = [0, 176], sizes = [4, 16], strides = [1, 1]} : vector<4x256xf32> to vector<4x16xf32>
    %cst_101 = arith.constant dense<0.000000e+00> : vector<4x32xf32>
    %194 = tpu.matmul %193, %10, %cst_101 {dimension_numbers = #tpu.dot_dimension_numbers<[1], [0], [0], [1], [0, 0, 1, 1], [], []>} : vector<4x16xf32>, vector<16x32xf32>, vector<4x32xf32> -> vector<4x32xf32>
    %195 = arith.addf %192, %194 : vector<4x32xf32>
    %c0_102 = arith.constant 0 : index
    %c0_103 = arith.constant 0 : index
    %c704 = arith.constant 704 : index
    %196 = vector.load %arg6[%c0_102, %c0_103, %c704] : memref<1x4x1024xf32, #tpu.memory_space<vmem>>, vector<1x4x32xf32>
    %197 = vector.shape_cast %196 : vector<1x4x32xf32> to vector<4x32xf32>
    %198 = vector.shape_cast %195 : vector<4x32xf32> to vector<1x4x32xf32>
    tpu.vector_store %arg6[%c0_102, %c0_103, %c704], %198 {strides = array<i32>} : memref<1x4x1024xf32, #tpu.memory_space<vmem>>, vector<1x4x32xf32>,
    %199 = vector.extract_strided_slice %13 {offsets = [0, 176], sizes = [4, 16], strides = [1, 1]} : vector<4x256xf32> to vector<4x16xf32>
    %cst_104 = arith.constant dense<0.000000e+00> : vector<4x32xf32>
    %200 = tpu.matmul %199, %8, %cst_104 {dimension_numbers = #tpu.dot_dimension_numbers<[1], [0], [0], [1], [0, 0, 1, 1], [], []>} : vector<4x16xf32>, vector<16x32xf32>, vector<4x32xf32> -> vector<4x32xf32>
    %201 = vector.extract_strided_slice %14 {offsets = [0, 176], sizes = [4, 16], strides = [1, 1]} : vector<4x256xf32> to vector<4x16xf32>
    %cst_105 = arith.constant dense<0.000000e+00> : vector<4x32xf32>
    %202 = tpu.matmul %201, %10, %cst_105 {dimension_numbers = #tpu.dot_dimension_numbers<[1], [0], [0], [1], [0, 0, 1, 1], [], []>} : vector<4x16xf32>, vector<16x32xf32>, vector<4x32xf32> -> vector<4x32xf32>
    %203 = arith.addf %200, %202 : vector<4x32xf32>
    %c0_106 = arith.constant 0 : index
    %c0_107 = arith.constant 0 : index
    %c736 = arith.constant 736 : index
    %204 = vector.load %arg6[%c0_106, %c0_107, %c736] : memref<1x4x1024xf32, #tpu.memory_space<vmem>>, vector<1x4x32xf32>
    %205 = vector.shape_cast %204 : vector<1x4x32xf32> to vector<4x32xf32>
    %206 = vector.shape_cast %203 : vector<4x32xf32> to vector<1x4x32xf32>
    tpu.vector_store %arg6[%c0_106, %c0_107, %c736], %206 {strides = array<i32>} : memref<1x4x1024xf32, #tpu.memory_space<vmem>>, vector<1x4x32xf32>,
    %207 = vector.extract_strided_slice %11 {offsets = [0, 192], sizes = [4, 16], strides = [1, 1]} : vector<4x256xf32> to vector<4x16xf32>
    %cst_108 = arith.constant dense<0.000000e+00> : vector<4x32xf32>
    %208 = tpu.matmul %207, %8, %cst_108 {dimension_numbers = #tpu.dot_dimension_numbers<[1], [0], [0], [1], [0, 0, 1, 1], [], []>} : vector<4x16xf32>, vector<16x32xf32>, vector<4x32xf32> -> vector<4x32xf32>
    %209 = vector.extract_strided_slice %12 {offsets = [0, 192], sizes = [4, 16], strides = [1, 1]} : vector<4x256xf32> to vector<4x16xf32>
    %cst_109 = arith.constant dense<0.000000e+00> : vector<4x32xf32>
    %210 = tpu.matmul %209, %10, %cst_109 {dimension_numbers = #tpu.dot_dimension_numbers<[1], [0], [0], [1], [0, 0, 1, 1], [], []>} : vector<4x16xf32>, vector<16x32xf32>, vector<4x32xf32> -> vector<4x32xf32>
    %211 = arith.addf %208, %210 : vector<4x32xf32>
    %c0_110 = arith.constant 0 : index
    %c0_111 = arith.constant 0 : index
    %c768 = arith.constant 768 : index
    %212 = vector.load %arg6[%c0_110, %c0_111, %c768] : memref<1x4x1024xf32, #tpu.memory_space<vmem>>, vector<1x4x32xf32>
    %213 = vector.shape_cast %212 : vector<1x4x32xf32> to vector<4x32xf32>
    %214 = vector.shape_cast %211 : vector<4x32xf32> to vector<1x4x32xf32>
    tpu.vector_store %arg6[%c0_110, %c0_111, %c768], %214 {strides = array<i32>} : memref<1x4x1024xf32, #tpu.memory_space<vmem>>, vector<1x4x32xf32>,
    %215 = vector.extract_strided_slice %13 {offsets = [0, 192], sizes = [4, 16], strides = [1, 1]} : vector<4x256xf32> to vector<4x16xf32>
    %cst_112 = arith.constant dense<0.000000e+00> : vector<4x32xf32>
    %216 = tpu.matmul %215, %8, %cst_112 {dimension_numbers = #tpu.dot_dimension_numbers<[1], [0], [0], [1], [0, 0, 1, 1], [], []>} : vector<4x16xf32>, vector<16x32xf32>, vector<4x32xf32> -> vector<4x32xf32>
    %217 = vector.extract_strided_slice %14 {offsets = [0, 192], sizes = [4, 16], strides = [1, 1]} : vector<4x256xf32> to vector<4x16xf32>
    %cst_113 = arith.constant dense<0.000000e+00> : vector<4x32xf32>
    %218 = tpu.matmul %217, %10, %cst_113 {dimension_numbers = #tpu.dot_dimension_numbers<[1], [0], [0], [1], [0, 0, 1, 1], [], []>} : vector<4x16xf32>, vector<16x32xf32>, vector<4x32xf32> -> vector<4x32xf32>
    %219 = arith.addf %216, %218 : vector<4x32xf32>
    %c0_114 = arith.constant 0 : index
    %c0_115 = arith.constant 0 : index
    %c800 = arith.constant 800 : index
    %220 = vector.load %arg6[%c0_114, %c0_115, %c800] : memref<1x4x1024xf32, #tpu.memory_space<vmem>>, vector<1x4x32xf32>
    %221 = vector.shape_cast %220 : vector<1x4x32xf32> to vector<4x32xf32>
    %222 = vector.shape_cast %219 : vector<4x32xf32> to vector<1x4x32xf32>
    tpu.vector_store %arg6[%c0_114, %c0_115, %c800], %222 {strides = array<i32>} : memref<1x4x1024xf32, #tpu.memory_space<vmem>>, vector<1x4x32xf32>,
    %223 = vector.extract_strided_slice %11 {offsets = [0, 208], sizes = [4, 16], strides = [1, 1]} : vector<4x256xf32> to vector<4x16xf32>
    %cst_116 = arith.constant dense<0.000000e+00> : vector<4x32xf32>
    %224 = tpu.matmul %223, %8, %cst_116 {dimension_numbers = #tpu.dot_dimension_numbers<[1], [0], [0], [1], [0, 0, 1, 1], [], []>} : vector<4x16xf32>, vector<16x32xf32>, vector<4x32xf32> -> vector<4x32xf32>
    %225 = vector.extract_strided_slice %12 {offsets = [0, 208], sizes = [4, 16], strides = [1, 1]} : vector<4x256xf32> to vector<4x16xf32>
    %cst_117 = arith.constant dense<0.000000e+00> : vector<4x32xf32>
    %226 = tpu.matmul %225, %10, %cst_117 {dimension_numbers = #tpu.dot_dimension_numbers<[1], [0], [0], [1], [0, 0, 1, 1], [], []>} : vector<4x16xf32>, vector<16x32xf32>, vector<4x32xf32> -> vector<4x32xf32>
    %227 = arith.addf %224, %226 : vector<4x32xf32>
    %c0_118 = arith.constant 0 : index
    %c0_119 = arith.constant 0 : index
    %c832 = arith.constant 832 : index
    %228 = vector.load %arg6[%c0_118, %c0_119, %c832] : memref<1x4x1024xf32, #tpu.memory_space<vmem>>, vector<1x4x32xf32>
    %229 = vector.shape_cast %228 : vector<1x4x32xf32> to vector<4x32xf32>
    %230 = vector.shape_cast %227 : vector<4x32xf32> to vector<1x4x32xf32>
    tpu.vector_store %arg6[%c0_118, %c0_119, %c832], %230 {strides = array<i32>} : memref<1x4x1024xf32, #tpu.memory_space<vmem>>, vector<1x4x32xf32>,
    %231 = vector.extract_strided_slice %13 {offsets = [0, 208], sizes = [4, 16], strides = [1, 1]} : vector<4x256xf32> to vector<4x16xf32>
    %cst_120 = arith.constant dense<0.000000e+00> : vector<4x32xf32>
    %232 = tpu.matmul %231, %8, %cst_120 {dimension_numbers = #tpu.dot_dimension_numbers<[1], [0], [0], [1], [0, 0, 1, 1], [], []>} : vector<4x16xf32>, vector<16x32xf32>, vector<4x32xf32> -> vector<4x32xf32>
    %233 = vector.extract_strided_slice %14 {offsets = [0, 208], sizes = [4, 16], strides = [1, 1]} : vector<4x256xf32> to vector<4x16xf32>
    %cst_121 = arith.constant dense<0.000000e+00> : vector<4x32xf32>
    %234 = tpu.matmul %233, %10, %cst_121 {dimension_numbers = #tpu.dot_dimension_numbers<[1], [0], [0], [1], [0, 0, 1, 1], [], []>} : vector<4x16xf32>, vector<16x32xf32>, vector<4x32xf32> -> vector<4x32xf32>
    %235 = arith.addf %232, %234 : vector<4x32xf32>
    %c0_122 = arith.constant 0 : index
    %c0_123 = arith.constant 0 : index
    %c864 = arith.constant 864 : index
    %236 = vector.load %arg6[%c0_122, %c0_123, %c864] : memref<1x4x1024xf32, #tpu.memory_space<vmem>>, vector<1x4x32xf32>
    %237 = vector.shape_cast %236 : vector<1x4x32xf32> to vector<4x32xf32>
    %238 = vector.shape_cast %235 : vector<4x32xf32> to vector<1x4x32xf32>
    tpu.vector_store %arg6[%c0_122, %c0_123, %c864], %238 {strides = array<i32>} : memref<1x4x1024xf32, #tpu.memory_space<vmem>>, vector<1x4x32xf32>,
    %239 = vector.extract_strided_slice %11 {offsets = [0, 224], sizes = [4, 16], strides = [1, 1]} : vector<4x256xf32> to vector<4x16xf32>
    %cst_124 = arith.constant dense<0.000000e+00> : vector<4x32xf32>
    %240 = tpu.matmul %239, %8, %cst_124 {dimension_numbers = #tpu.dot_dimension_numbers<[1], [0], [0], [1], [0, 0, 1, 1], [], []>} : vector<4x16xf32>, vector<16x32xf32>, vector<4x32xf32> -> vector<4x32xf32>
    %241 = vector.extract_strided_slice %12 {offsets = [0, 224], sizes = [4, 16], strides = [1, 1]} : vector<4x256xf32> to vector<4x16xf32>
    %cst_125 = arith.constant dense<0.000000e+00> : vector<4x32xf32>
    %242 = tpu.matmul %241, %10, %cst_125 {dimension_numbers = #tpu.dot_dimension_numbers<[1], [0], [0], [1], [0, 0, 1, 1], [], []>} : vector<4x16xf32>, vector<16x32xf32>, vector<4x32xf32> -> vector<4x32xf32>
    %243 = arith.addf %240, %242 : vector<4x32xf32>
    %c0_126 = arith.constant 0 : index
    %c0_127 = arith.constant 0 : index
    %c896 = arith.constant 896 : index
    %244 = vector.load %arg6[%c0_126, %c0_127, %c896] : memref<1x4x1024xf32, #tpu.memory_space<vmem>>, vector<1x4x32xf32>
    %245 = vector.shape_cast %244 : vector<1x4x32xf32> to vector<4x32xf32>
    %246 = vector.shape_cast %243 : vector<4x32xf32> to vector<1x4x32xf32>
    tpu.vector_store %arg6[%c0_126, %c0_127, %c896], %246 {strides = array<i32>} : memref<1x4x1024xf32, #tpu.memory_space<vmem>>, vector<1x4x32xf32>,
    %247 = vector.extract_strided_slice %13 {offsets = [0, 224], sizes = [4, 16], strides = [1, 1]} : vector<4x256xf32> to vector<4x16xf32>
    %cst_128 = arith.constant dense<0.000000e+00> : vector<4x32xf32>
    %248 = tpu.matmul %247, %8, %cst_128 {dimension_numbers = #tpu.dot_dimension_numbers<[1], [0], [0], [1], [0, 0, 1, 1], [], []>} : vector<4x16xf32>, vector<16x32xf32>, vector<4x32xf32> -> vector<4x32xf32>
    %249 = vector.extract_strided_slice %14 {offsets = [0, 224], sizes = [4, 16], strides = [1, 1]} : vector<4x256xf32> to vector<4x16xf32>
    %cst_129 = arith.constant dense<0.000000e+00> : vector<4x32xf32>
    %250 = tpu.matmul %249, %10, %cst_129 {dimension_numbers = #tpu.dot_dimension_numbers<[1], [0], [0], [1], [0, 0, 1, 1], [], []>} : vector<4x16xf32>, vector<16x32xf32>, vector<4x32xf32> -> vector<4x32xf32>
    %251 = arith.addf %248, %250 : vector<4x32xf32>
    %c0_130 = arith.constant 0 : index
    %c0_131 = arith.constant 0 : index
    %c928 = arith.constant 928 : index
    %252 = vector.load %arg6[%c0_130, %c0_131, %c928] : memref<1x4x1024xf32, #tpu.memory_space<vmem>>, vector<1x4x32xf32>
    %253 = vector.shape_cast %252 : vector<1x4x32xf32> to vector<4x32xf32>
    %254 = vector.shape_cast %251 : vector<4x32xf32> to vector<1x4x32xf32>
    tpu.vector_store %arg6[%c0_130, %c0_131, %c928], %254 {strides = array<i32>} : memref<1x4x1024xf32, #tpu.memory_space<vmem>>, vector<1x4x32xf32>,
    %255 = vector.extract_strided_slice %11 {offsets = [0, 240], sizes = [4, 16], strides = [1, 1]} : vector<4x256xf32> to vector<4x16xf32>
    %cst_132 = arith.constant dense<0.000000e+00> : vector<4x32xf32>
    %256 = tpu.matmul %255, %8, %cst_132 {dimension_numbers = #tpu.dot_dimension_numbers<[1], [0], [0], [1], [0, 0, 1, 1], [], []>} : vector<4x16xf32>, vector<16x32xf32>, vector<4x32xf32> -> vector<4x32xf32>
    %257 = vector.extract_strided_slice %12 {offsets = [0, 240], sizes = [4, 16], strides = [1, 1]} : vector<4x256xf32> to vector<4x16xf32>
    %cst_133 = arith.constant dense<0.000000e+00> : vector<4x32xf32>
    %258 = tpu.matmul %257, %10, %cst_133 {dimension_numbers = #tpu.dot_dimension_numbers<[1], [0], [0], [1], [0, 0, 1, 1], [], []>} : vector<4x16xf32>, vector<16x32xf32>, vector<4x32xf32> -> vector<4x32xf32>
    %259 = arith.addf %256, %258 : vector<4x32xf32>
    %c0_134 = arith.constant 0 : index
    %c0_135 = arith.constant 0 : index
    %c960 = arith.constant 960 : index
    %260 = vector.load %arg6[%c0_134, %c0_135, %c960] : memref<1x4x1024xf32, #tpu.memory_space<vmem>>, vector<1x4x32xf32>
    %261 = vector.shape_cast %260 : vector<1x4x32xf32> to vector<4x32xf32>
    %262 = vector.shape_cast %259 : vector<4x32xf32> to vector<1x4x32xf32>
    tpu.vector_store %arg6[%c0_134, %c0_135, %c960], %262 {strides = array<i32>} : memref<1x4x1024xf32, #tpu.memory_space<vmem>>, vector<1x4x32xf32>,
    %263 = vector.extract_strided_slice %13 {offsets = [0, 240], sizes = [4, 16], strides = [1, 1]} : vector<4x256xf32> to vector<4x16xf32>
    %cst_136 = arith.constant dense<0.000000e+00> : vector<4x32xf32>
    %264 = tpu.matmul %263, %8, %cst_136 {dimension_numbers = #tpu.dot_dimension_numbers<[1], [0], [0], [1], [0, 0, 1, 1], [], []>} : vector<4x16xf32>, vector<16x32xf32>, vector<4x32xf32> -> vector<4x32xf32>
    %265 = vector.extract_strided_slice %14 {offsets = [0, 240], sizes = [4, 16], strides = [1, 1]} : vector<4x256xf32> to vector<4x16xf32>
    %cst_137 = arith.constant dense<0.000000e+00> : vector<4x32xf32>
    %266 = tpu.matmul %265, %10, %cst_137 {dimension_numbers = #tpu.dot_dimension_numbers<[1], [0], [0], [1], [0, 0, 1, 1], [], []>} : vector<4x16xf32>, vector<16x32xf32>, vector<4x32xf32> -> vector<4x32xf32>
    %267 = arith.addf %264, %266 : vector<4x32xf32>
    %c0_138 = arith.constant 0 : index
    %c0_139 = arith.constant 0 : index
    %c992 = arith.constant 992 : index
    %268 = vector.load %arg6[%c0_138, %c0_139, %c992] : memref<1x4x1024xf32, #tpu.memory_space<vmem>>, vector<1x4x32xf32>
    %269 = vector.shape_cast %268 : vector<1x4x32xf32> to vector<4x32xf32>
    %270 = vector.shape_cast %267 : vector<4x32xf32> to vector<1x4x32xf32>
    tpu.vector_store %arg6[%c0_138, %c0_139, %c992], %270 {strides = array<i32>} : memref<1x4x1024xf32, #tpu.memory_space<vmem>>, vector<1x4x32xf32>,
    return
  }
  func.func @transform_0(%arg0: i32, %arg1: i32) -> (i32, i32, i32) {
    %c0_i32 = arith.constant 0 : i32
    %c0_i32_0 = arith.constant 0 : i32
    return %arg0, %c0_i32, %arg1 : i32, i32, i32
  }
  func.func @transform_1(%arg0: i32, %arg1: i32) -> (i32, i32) {
    %c0_i32 = arith.constant 0 : i32
    %c0_i32_0 = arith.constant 0 : i32
    %c0_i32_1 = arith.constant 0 : i32
    return %c0_i32, %c0_i32_0 : i32, i32
  }
  func.func @transform_2(%arg0: i32, %arg1: i32) -> (i32, i32) {
    %c0_i32 = arith.constant 0 : i32
    %c0_i32_0 = arith.constant 0 : i32
    %c0_i32_1 = arith.constant 0 : i32
    return %c0_i32, %c0_i32_0 : i32, i32
  }
  func.func @transform_3(%arg0: i32, %arg1: i32) -> (i32, i32, i32) {
    %c0_i32 = arith.constant 0 : i32
    %c0_i32_0 = arith.constant 0 : i32
    %c0_i32_1 = arith.constant 0 : i32
    %c0_i32_2 = arith.constant 0 : i32
    return %c0_i32, %c0_i32_0, %c0_i32_1 : i32, i32, i32
  }
  func.func @transform_4(%arg0: i32, %arg1: i32) -> (i32, i32, i32) {
    %c0_i32 = arith.constant 0 : i32
    %c0_i32_0 = arith.constant 0 : i32
    return %arg0, %c0_i32, %arg1 : i32, i32, i32
  }
}

</mosaic_0001>

<bundles_post_ra>
// kernel: tile.8
= control target key start
LH: loop header
LB: loop body
LE: loop exit
PB: predicated region body
PF: predicated region fallthrough
CT: control target
= control target key end

     0   :  { %s22_s0 = inlined_call_operand.vmem [shape: f32[4], index: 0, kind: input, shape index: {}]   ;;  %s23_s1 = inlined_call_operand.vmem [shape: f32[4,4], index: 1, kind: output, shape index: {}]  }
   0x1   :  { %v4_v0 = vld [vmem:[%s22_s0] ss:$0 sm:$0xff] }
   0x2   :  { %5 = vst [vmem:[%s23_s1] sm:$0xf] %v4_v0 }

// kernel: tile.0
= control target key start
LH: loop header
LB: loop body
LE: loop exit
PB: predicated region body
PF: predicated region fallthrough
CT: control target
= control target key end

     0   :  { %s35_s8 = smov 125   ;;  %vm8_vm0 = vcmask 7168   ;;  %s36_s11 = smov 126   ;;  %s62_s0 = inlined_call_operand.vmem [shape: f32[4,4], index: 0, kind: input, shape index: {}]   ;;  %s63_s1 = inlined_call_operand.vmem [shape: f32[16,1], index: 1, kind: output, shape index: {}]  }
   0x1   :  { %v5_v0 = vld [vmem:[%s62_s0] sm:$0xf]  ;;  %s34_s0 = smov 127  }
   0x2   :  { %6 = vst [vmem:[#allocation0] sm:$0xf] %v5_v0 }
   0x9   :  { %v10_v1 = vld [vmem:[#allocation0] sm:$0xf]  }
   0xa   :  { %v22_v2 = vld [vmem:[#allocation0] sm:$0xf]   ;;  %11 = vrot.lane.b32.xlu0 %v10_v1, %s34_s0 }
   0xb   :  { %23 = vrot.lane.b32.xlu1 %v22_v2, %s35_s8  ;;  %v7_v3 = vld [vmem:[#allocation0] sm:$0xf]  }
   0xc   :  { %v16_v4 = vld [vmem:[#allocation0] sm:$0xf]   ;;  %9 = vst.msk [vmem:[%s63_s1] ss:$4 sm:$0xf] %vm8_vm0, %v7_v3  }
   0xe   :  { %17 = vrot.lane.b32.xlu0 %v16_v4, %s36_s11 }
  0x7c   :  { %v12_v5 = vpop.permute.xlu0 %11  }
  0x7d   :  { %v24_v6 = vpop.permute.xlu1 %23   ;;  %28 = vst.msk [vmem:[%s63_s1 + $0x1] ss:$4 sm:$0xf] %vm8_vm0, %v12_v5  }
  0x7e   :  { %30 = vst.msk [vmem:[%s63_s1 + $0x3] ss:$4 sm:$0xf] %vm8_vm0, %v24_v6  }
  0x80   :  { %v18_v7 = vpop.permute.xlu0 %17  }
  0x81   :  { %29 = vst.msk [vmem:[%s63_s1 + $0x2] ss:$4 sm:$0xf] %vm8_vm0, %v18_v7  }

// kernel: upsample_block_transp_conv.1
= control target key start
LH: loop header
LB: loop body
LE: loop exit
PB: predicated region body
PF: predicated region fallthrough
CT: control target
= control target key end

     0   :  { %s6116_s15 = smov 0   ;;  %s6118_s16 = smov 0   ;;  %s6855_s0 = inlined_call_operand.vmem [shape: f32[2,4,256], index: 0, kind: input, shape index: {}]   ;;  %s6856_s1 = inlined_call_operand.vmem [shape: f32[16,4], index: 1, kind: input, shape index: {}]   ;;  %s6857_s2 = inlined_call_operand.vmem [shape: f32[16,1], index: 2, kind: input, shape index: {}]   ;;  %s6858_s3 = inlined_call_operand.vmem [shape: f32[2,16,32], index: 3, kind: input, shape index: {}]   ;;  %s6859_s4 = inlined_call_operand.vmem [shape: f32[2,4,1024], index: 4, kind: output, shape index: {}]  }
   0x1   :  { %s6120_s17 = smov 0  }
   0x2 LB: > { %s26_s18 = sadd.s32 1, %s6075_s16  ;;  %p5300_p0 = scmp.ge.s32.totalorder %s6079_s17, 1  ;;  %s6079_s17 = sphi %s6120_s17, %s14_s17   ;;  %s6075_s16 = sphi %s6118_s16, %s6861_s16   ;;  %s6071_s15 = sphi %s6116_s15, %s6860_s15  }
   0x3   : > { %p28_p1 = scmp.ge.s32.totalorder %s26_s18, 2  ;;  %p183_p2 = scmp.lt.s32.totalorder %s6079_s17, 3 }
   0x5   : > { %s6863_s18 = smov (%p28_p1, %s26_s18), 0  ;;  %p184_p3 = pnand %p5300_p0, %p183_p2 }
   0x6   : > { %p218_p4 = scmp.lt.s32.totalorder (!%p184_p3), %s6071_s15, 1  ;;  %s6084_s9 = smov (!%p184_p3), 112  }
   0x7   : > { %187 = sbr.rel (%p184_p3) target bundleno = 817 (0x331), region = 36  ;;  %s6085_s14 = smov (!%p184_p3), 96  }
   0x8   : > { %s6086_s19 = smov (!%p184_p3), 80   ;;  %s6087_s20 = smov (!%p184_p3), 64  }
   0x9   : > { %s6089_s22 = smov (!%p184_p3), 32   ;;  %s6090_s23 = smov (!%p184_p3), 16  }
   0xc   : > { %v6081_v0 = vmov 0.0   ;;  %v240_v1 = vld [vmem:[%s6857_s2] sm:$0xff]  ;;  %s6865_s15 = smov (!%p218_p4, %s6071_s15), 1  ;;  %v6082_v2 = vmov 0   ;;  %v241_v3 = vld [vmem:[%s6857_s2 + $0x8] sm:$0xff]  ;;  %vm261_vm0 = vcmask 1043456  }
   0xd   : > { %330 = vmatprep.mubr.f32.mxu0 %v6081_v0  ;;  %5571 = vmatprep.subr.mxu1 %v6081_v0  ;;  %s5377_s21 = sshll.u32 %s6865_s15, 3  ;;  %v237_v6 = vld [vmem:[%s6856_s1] sm:$0xff]  ;;  %vm254_vm1 = vcmask 31744   ;;  %v238_v7 = vld [vmem:[%s6856_s1 + $0x8] sm:$0xff]  ;;  %v6159_v8 = vld [vmem:[%s6858_s3 + $0x18] sm:$0xff]  ;;  %vm6083_vm2 = vmmov 0  }
   0xe   : > { %6053 = vset.pattern.permute.xlu0 %v6082_v2  ;;  %s225_s26 = scalar_lea.vmem %s6855_s0, %s5377_s21  ;;  %5572 = vmatpush3.msra.mxu1 %v6159_v8  ;;  %v6167_v9 = vld [vmem:[%s6858_s3 + $0x10] sm:$0xff]  ;;  %vm350_vm3 = vcmask 130048   ;;  %v6191_v15 = vld [vmem:[%s6858_s3 + $0x8] sm:$0xff]  ;;  %v6200_v19 = vld [vmem:[%s6858_s3] sm:$0xff]  ;;  %s6088_s21 = smov 48   ;;  %vm495_vm4 = vcmask 257024  }
   0xf   : > { %244 = vperm.xlu0 %6053, %v240_v1   ;;  %v239_v4 = vld [vmem:[%s225_s26] sm:$0xff]  ;;  %5573 = vmatprep.subr.mxu1 %v6081_v0  ;;  %s5378_s24 = sshll.u32 %s6865_s15, 5  ;;  %vm647_vm5 = vcmask 519424   ;;  %vm801_vm6 = vcmask 781824   ;;  %vm955_vm7 = vcmask 1044224  }
  0x10   : > { %v253_v5 = vcombine.high %v239_v4, %v239_v4  ;;  %5574 = vmatpush3.msra.mxu1 %v6167_v9  ;;  %5575 = vmatprep.mubr.msk.f32.mxu1 %vm6083_vm2, %v6081_v0  ;;  %s6523_s27 = scalar_lea.vmem %s6859_s4, %s5378_s24 }
  0x11   : > { %5578 = vmatprep.subr.mxu1 %v6081_v0 }
  0x12   : > { %5305 = vmatprep.subr.msk.mxu0 %vm261_vm0, %v253_v5 }
  0x13   : > { %249 = vperm.xlu0 %6053, %v241_v3   ;;  %5306 = vmatpush1.msk.msra.mxu0 %vm261_vm0, %v239_v4 }
  0x14   : > { %5307 = vmatmul.mubr.msk.f32.vlgmr.msra.gmra.mxu0 %vm254_vm1, %v237_v6  ;;  %5585 = vmatprep.subr.mxu0 %v6081_v0 }
  0x15   : > { %336 = vmatprep.mubr.f32.mxu0 %v6081_v0  ;;  %5586 = vmatpush3.msra.mxu0 %v6159_v8 }
  0x16   : > { %5587 = vmatprep.subr.mxu0 %v6081_v0 }
  0x17   : > { %5588 = vmatpush3.msra.mxu0 %v6167_v9 }
  0x18   : > { %5308 = vmatmul.mubr.msk.f32.gmra.mxu0 %vm254_vm1, %v238_v7  ;;  %5599 = vmatprep.subr.mxu0 %v6081_v0 }
  0x19   : > { %5589 = vmatprep.mubr.msk.f32.mxu0 %vm6083_vm2, %v6081_v0 }
  0x8a   : > { %v6178_v10 = vpop.permute.xlu0 %244 }
  0x8e   : > { %v6193_v16 = vpop.permute.xlu0 %249 }
  0xd4   : > { %v332_v11 = vpop.f32.mrf.mxu0 }
  0xd5   : > { %v6181_v12 = vadd.f32 %v332_v11, %v6178_v10 }
  0xd6   : > { %v6183_v13 = vpop.f32.mrf.mxu0 }
  0xd7   : > { %723 = vrot.lane.b32.xlu1 %v6181_v12, %s6084_s9  ;;  %v349_v14 = vrot.slane %v6181_v12, 4  ;;  %v6261_v21 = vadd.f32 %v6183_v13, %v6178_v10 }
  0xd8   : > { %v338_v17 = vpop.f32.mrf.mxu0 }
  0xd9   : > { %v339_v18 = vadd.f32 %v338_v17, %v6193_v16  ;;  %5576 = vmatmul.mubr.msk.f32.vlgmr.msra.gmra.mxu1 %vm350_vm3, %v349_v14  ;;  %v6271_v24 = vrot.slane %v6261_v21, 4 }
  0xda   : > { %5579 = vmatpush3.msra.mxu1 %v6191_v15  ;;  %5582 = vmatprep.mubr.msk.f32.mxu1 %vm6083_vm2, %v6081_v0  ;;  %v340_v22 = vpop.f32.mrf.mxu0 }
  0xdb   : > { %649 = vrot.lane.b32.xlu1 %v349_v14, %s6084_s9  ;;  %5580 = vmatprep.subr.mxu1 %v6081_v0  ;;  %v498_v20 = vrot.slane %v339_v18, 4  ;;  %v6267_v23 = vadd.f32 %v340_v22, %v6193_v16 }
  0xdc   : > { %5581 = vmatpush3.msra.mxu1 %v6200_v19 }
  0xdd   : > { %803 = vrot.lane.b32.xlu0 %v498_v20, %s6084_s9  ;;  %5583 = vmatmul.mubr.msk.f32.vlgmr.msra.gmra.mxu1 %vm350_vm3, %v6181_v12  ;;  %v6278_v25 = vrot.slane %v6267_v23, 4 }
  0xde   : > { %5590 = vmatmul.mubr.msk.f32.vlgmr.msra.gmra.mxu0 %vm350_vm3, %v498_v20  ;;  %5592 = vmatprep.subr.mxu1 %v6081_v0 }
  0xdf   : > { %5593 = vmatpush3.msra.mxu1 %v6191_v15  ;;  %877 = vrot.lane.b32.xlu1 %v339_v18, %s6084_s9 }
  0xe0   : > { %5594 = vmatprep.subr.mxu1 %v6081_v0  ;;  %5596 = vmatprep.mubr.msk.f32.mxu1 %vm6083_vm2, %v6081_v0 }
  0xe1   : > { %5595 = vmatpush3.msra.mxu1 %v6200_v19  ;;  %957 = vrot.lane.b32.xlu0 %v349_v14, %s6085_s14 }
  0xe2   : > { %5597 = vmatmul.mubr.msk.f32.vlgmr.msra.gmra.mxu1 %vm350_vm3, %v339_v18  ;;  %5606 = vmatprep.subr.mxu1 %v6081_v0 }
  0xe3   : > { %1031 = vrot.lane.b32.xlu1 %v6181_v12, %s6085_s14  ;;  %5607 = vmatpush3.msra.mxu1 %v6191_v15 }
  0xe4   : > { %5608 = vmatprep.subr.mxu1 %v6081_v0  ;;  %5610 = vmatprep.mubr.msk.f32.mxu1 %vm6083_vm2, %v6081_v0 }
  0xe5   : > { %1106 = vrot.lane.b32.xlu0 %v498_v20, %s6085_s14  ;;  %5609 = vmatpush3.msra.mxu1 %v6200_v19 }
  0xe6   : > { %5600 = vmatpush3.msra.mxu0 %v6159_v8  ;;  %5603 = vmatprep.mubr.msk.f32.mxu0 %vm6083_vm2, %v6081_v0 }
  0xe7   : > { %1180 = vrot.lane.b32.xlu1 %v339_v18, %s6085_s14  ;;  %5601 = vmatprep.subr.mxu0 %v6081_v0 }
  0xe8   : > { %5602 = vmatpush3.msra.mxu0 %v6167_v9  ;;  %5620 = vmatprep.subr.mxu1 %v6081_v0 }
  0xe9   : > { %1259 = vrot.lane.b32.xlu0 %v349_v14, %s6086_s19  ;;  %5613 = vmatprep.subr.mxu0 %v6081_v0 }
  0xeb   : > { %1333 = vrot.lane.b32.xlu1 %v6181_v12, %s6086_s19 }
  0xed   : > { %1412 = vrot.lane.b32.xlu0 %v498_v20, %s6086_s19 }
  0xef   : > { %1486 = vrot.lane.b32.xlu1 %v339_v18, %s6086_s19 }
  0xf1   : > { %1565 = vrot.lane.b32.xlu0 %v349_v14, %s6087_s20 }
  0xf3   : > { %1639 = vrot.lane.b32.xlu1 %v6181_v12, %s6087_s20 }
  0xf5   : > { %1714 = vrot.lane.b32.xlu0 %v498_v20, %s6087_s20 }
  0xf7   : > { %1788 = vrot.lane.b32.xlu1 %v339_v18, %s6087_s20 }
  0xf9   : > { %1867 = vrot.lane.b32.xlu0 %v349_v14, %s6088_s21 }
  0xfb   : > { %1941 = vrot.lane.b32.xlu1 %v6181_v12, %s6088_s21 }
  0xfd   : > { %2020 = vrot.lane.b32.xlu0 %v498_v20, %s6088_s21 }
  0xff   : > { %2094 = vrot.lane.b32.xlu1 %v339_v18, %s6088_s21 }
 0x101   : > { %2173 = vrot.lane.b32.xlu0 %v349_v14, %s6089_s22 }
 0x103   : > { %2247 = vrot.lane.b32.xlu1 %v6181_v12, %s6089_s22 }
 0x105   : > { %2322 = vrot.lane.b32.xlu0 %v498_v20, %s6089_s22 }
 0x107   : > { %2396 = vrot.lane.b32.xlu1 %v339_v18, %s6089_s22 }
 0x109   : > { %2475 = vrot.lane.b32.xlu0 %v349_v14, %s6090_s23 }
 0x10b   : > { %2549 = vrot.lane.b32.xlu1 %v6181_v12, %s6090_s23 }
 0x10d   : > { %2628 = vrot.lane.b32.xlu0 %v498_v20, %s6090_s23 }
 0x10f   : > { %2702 = vrot.lane.b32.xlu1 %v339_v18, %s6090_s23 }
 0x111   : > { %3079 = vrot.lane.b32.xlu0 %v6271_v24, %s6084_s9 }
 0x113   : > { %3153 = vrot.lane.b32.xlu1 %v6261_v21, %s6084_s9 }
 0x115   : > { %3232 = vrot.lane.b32.xlu0 %v6278_v25, %s6084_s9 }
 0x117   : > { %3306 = vrot.lane.b32.xlu1 %v6267_v23, %s6084_s9 }
 0x119   : > { %3385 = vrot.lane.b32.xlu0 %v6271_v24, %s6085_s14 }
 0x11b   : > { %3459 = vrot.lane.b32.xlu1 %v6261_v21, %s6085_s14 }
 0x11d   : > { %3534 = vrot.lane.b32.xlu0 %v6278_v25, %s6085_s14 }
 0x11f   : > { %3608 = vrot.lane.b32.xlu1 %v6267_v23, %s6085_s14 }
 0x121   : > { %3687 = vrot.lane.b32.xlu0 %v6271_v24, %s6086_s19 }
 0x123   : > { %3761 = vrot.lane.b32.xlu1 %v6261_v21, %s6086_s19 }
 0x125   : > { %3840 = vrot.lane.b32.xlu0 %v6278_v25, %s6086_s19 }
 0x127   : > { %3914 = vrot.lane.b32.xlu1 %v6267_v23, %s6086_s19 }
 0x129   : > { %3993 = vrot.lane.b32.xlu0 %v6271_v24, %s6087_s20 }
 0x12b   : > { %4067 = vrot.lane.b32.xlu1 %v6261_v21, %s6087_s20 }
 0x12d   : > { %4142 = vrot.lane.b32.xlu0 %v6278_v25, %s6087_s20 }
 0x12f   : > { %4216 = vrot.lane.b32.xlu1 %v6267_v23, %s6087_s20 }
 0x131   : > { %4295 = vrot.lane.b32.xlu0 %v6271_v24, %s6088_s21 }
 0x133   : > { %4369 = vrot.lane.b32.xlu1 %v6261_v21, %s6088_s21 }
 0x135   : > { %4448 = vrot.lane.b32.xlu0 %v6278_v25, %s6088_s21 }
 0x137   : > { %4522 = vrot.lane.b32.xlu1 %v6267_v23, %s6088_s21 }
 0x139   : > { %4601 = vrot.lane.b32.xlu0 %v6271_v24, %s6089_s22 }
 0x13b   : > { %4675 = vrot.lane.b32.xlu1 %v6261_v21, %s6089_s22 }
 0x13d   : > { %4750 = vrot.lane.b32.xlu0 %v6278_v25, %s6089_s22 }
 0x13f   : > { %4824 = vrot.lane.b32.xlu1 %v6267_v23, %s6089_s22 }
 0x141   : > { %4903 = vrot.lane.b32.xlu0 %v6271_v24, %s6090_s23 }
 0x143   : > { %4977 = vrot.lane.b32.xlu1 %v6261_v21, %s6090_s23 }
 0x145   : > { %5056 = vrot.lane.b32.xlu0 %v6278_v25, %s6090_s23 }
 0x147   : > { %5130 = vrot.lane.b32.xlu1 %v6267_v23, %s6090_s23 }
 0x149   : > { %v724_v26 = vpop.permute.xlu1 %723 }
 0x14a   : > { %5611 = vmatmul.mubr.msk.f32.vlgmr.msra.gmra.mxu1 %vm350_vm3, %v724_v26 }
 0x14b   : > { %5621 = vmatpush3.msra.mxu1 %v6191_v15  ;;  %5624 = vmatprep.mubr.msk.f32.mxu1 %vm6083_vm2, %v6081_v0 }
 0x14c   : > { %5622 = vmatprep.subr.mxu1 %v6081_v0 }
 0x14d   : > { %v650_v27 = vpop.permute.xlu1 %649  ;;  %5623 = vmatpush3.msra.mxu1 %v6200_v19 }
 0x14e   : > { %5604 = vmatmul.mubr.msk.f32.vlgmr.msra.gmra.mxu0 %vm350_vm3, %v650_v27  ;;  %5634 = vmatprep.subr.mxu1 %v6081_v0 }
 0x14f   : > { %5614 = vmatpush3.msra.mxu0 %v6159_v8  ;;  %5617 = vmatprep.mubr.msk.f32.mxu0 %vm6083_vm2, %v6081_v0  ;;  %v804_v28 = vpop.permute.xlu0 %803 }
 0x150   : > { %5615 = vmatprep.subr.mxu0 %v6081_v0 }
 0x151   : > { %5616 = vmatpush3.msra.mxu0 %v6167_v9  ;;  %v878_v29 = vpop.permute.xlu1 %877 }
 0x152   : > { %5627 = vmatprep.subr.mxu0 %v6081_v0  ;;  %5618 = vmatmul.mubr.msk.f32.vlgmr.msra.gmra.mxu0 %vm350_vm3, %v804_v28 }
 0x153   : > { %5625 = vmatmul.mubr.msk.f32.vlgmr.msra.gmra.mxu1 %vm350_vm3, %v878_v29  ;;  %5628 = vmatpush3.msra.mxu0 %v6159_v8  ;;  %v958_v31 = vpop.permute.xlu0 %957 }
 0x154   : > { %5635 = vmatpush3.msra.mxu1 %v6191_v15  ;;  %5629 = vmatprep.subr.mxu0 %v6081_v0 }
 0x155   : > { %5636 = vmatprep.subr.mxu1 %v6081_v0  ;;  %5630 = vmatpush3.msra.mxu0 %v6167_v9  ;;  %v1032_v30 = vpop.permute.xlu1 %1031 }
 0x156   : > { %5637 = vmatpush3.msra.mxu1 %v6200_v19  ;;  %5631 = vmatprep.mubr.msk.f32.mxu0 %vm6083_vm2, %v6081_v0 }
 0x157   : > { %5641 = vmatprep.subr.mxu0 %v6081_v0  ;;  %5638 = vmatprep.mubr.msk.f32.mxu1 %vm6083_vm2, %v6081_v0  ;;  %v1107_v33 = vpop.permute.xlu0 %1106 }
 0x158   : > { %5648 = vmatprep.subr.mxu1 %v6081_v0  ;;  %5632 = vmatmul.mubr.msk.f32.vlgmr.msra.gmra.mxu0 %vm350_vm3, %v958_v31 }
 0x159   : > { %5639 = vmatmul.mubr.msk.f32.vlgmr.msra.gmra.mxu1 %vm350_vm3, %v1032_v30  ;;  %5642 = vmatpush3.msra.mxu0 %v6159_v8  ;;  %v1181_v32 = vpop.permute.xlu1 %1180 }
 0x15a   : > { %5649 = vmatpush3.msra.mxu1 %v6191_v15  ;;  %5643 = vmatprep.subr.mxu0 %v6081_v0 }
 0x15b   : > { %5650 = vmatprep.subr.mxu1 %v6081_v0  ;;  %5644 = vmatpush3.msra.mxu0 %v6167_v9  ;;  %v1260_v35 = vpop.permute.xlu0 %1259 }
 0x15c   : > { %5651 = vmatpush3.msra.mxu1 %v6200_v19  ;;  %5645 = vmatprep.mubr.msk.f32.mxu0 %vm6083_vm2, %v6081_v0 }
 0x15d   : > { %5655 = vmatprep.subr.mxu0 %v6081_v0  ;;  %5652 = vmatprep.mubr.msk.f32.mxu1 %vm6083_vm2, %v6081_v0  ;;  %v1334_v34 = vpop.permute.xlu1 %1333 }
 0x15e   : > { %5662 = vmatprep.subr.mxu1 %v6081_v0  ;;  %5646 = vmatmul.mubr.msk.f32.vlgmr.msra.gmra.mxu0 %vm350_vm3, %v1107_v33 }
 0x15f   : > { %5653 = vmatmul.mubr.msk.f32.vlgmr.msra.gmra.mxu1 %vm350_vm3, %v1181_v32  ;;  %5656 = vmatpush3.msra.mxu0 %v6159_v8  ;;  %v1413_v37 = vpop.permute.xlu0 %1412 }
 0x160   : > { %5663 = vmatpush3.msra.mxu1 %v6191_v15  ;;  %5657 = vmatprep.subr.mxu0 %v6081_v0 }
 0x161   : > { %5664 = vmatprep.subr.mxu1 %v6081_v0  ;;  %5658 = vmatpush3.msra.mxu0 %v6167_v9  ;;  %v1487_v36 = vpop.permute.xlu1 %1486 }
 0x162   : > { %5665 = vmatpush3.msra.mxu1 %v6200_v19  ;;  %5659 = vmatprep.mubr.msk.f32.mxu0 %vm6083_vm2, %v6081_v0 }
 0x163   : > { %5669 = vmatprep.subr.mxu0 %v6081_v0  ;;  %5666 = vmatprep.mubr.msk.f32.mxu1 %vm6083_vm2, %v6081_v0  ;;  %v1566_v39 = vpop.permute.xlu0 %1565 }
 0x164   : > { %5676 = vmatprep.subr.mxu1 %v6081_v0  ;;  %5660 = vmatmul.mubr.msk.f32.vlgmr.msra.gmra.mxu0 %vm350_vm3, %v1260_v35 }
 0x165   : > { %5667 = vmatmul.mubr.msk.f32.vlgmr.msra.gmra.mxu1 %vm350_vm3, %v1334_v34  ;;  %5670 = vmatpush3.msra.mxu0 %v6159_v8  ;;  %v1640_v38 = vpop.permute.xlu1 %1639 }
 0x166   : > { %5677 = vmatpush3.msra.mxu1 %v6191_v15  ;;  %5671 = vmatprep.subr.mxu0 %v6081_v0 }
 0x167   : > { %5678 = vmatprep.subr.mxu1 %v6081_v0  ;;  %5672 = vmatpush3.msra.mxu0 %v6167_v9  ;;  %v1715_v41 = vpop.permute.xlu0 %1714 }
 0x168   : > { %5679 = vmatpush3.msra.mxu1 %v6200_v19  ;;  %5673 = vmatprep.mubr.msk.f32.mxu0 %vm6083_vm2, %v6081_v0 }
 0x169   : > { %5683 = vmatprep.subr.mxu0 %v6081_v0  ;;  %5680 = vmatprep.mubr.msk.f32.mxu1 %vm6083_vm2, %v6081_v0  ;;  %v1789_v40 = vpop.permute.xlu1 %1788 }
 0x16a   : > { %5690 = vmatprep.subr.mxu1 %v6081_v0  ;;  %5674 = vmatmul.mubr.msk.f32.vlgmr.msra.gmra.mxu0 %vm350_vm3, %v1413_v37 }
 0x16b   : > { %5681 = vmatmul.mubr.msk.f32.vlgmr.msra.gmra.mxu1 %vm350_vm3, %v1487_v36  ;;  %5684 = vmatpush3.msra.mxu0 %v6159_v8  ;;  %v1868_v43 = vpop.permute.xlu0 %1867 }
 0x16c   : > { %5691 = vmatpush3.msra.mxu1 %v6191_v15  ;;  %5685 = vmatprep.subr.mxu0 %v6081_v0 }
 0x16d   : > { %5692 = vmatprep.subr.mxu1 %v6081_v0  ;;  %5686 = vmatpush3.msra.mxu0 %v6167_v9  ;;  %v1942_v42 = vpop.permute.xlu1 %1941 }
 0x16e   : > { %5693 = vmatpush3.msra.mxu1 %v6200_v19  ;;  %5687 = vmatprep.mubr.msk.f32.mxu0 %vm6083_vm2, %v6081_v0 }
 0x16f   : > { %5697 = vmatprep.subr.mxu0 %v6081_v0  ;;  %5694 = vmatprep.mubr.msk.f32.mxu1 %vm6083_vm2, %v6081_v0  ;;  %v2021_v45 = vpop.permute.xlu0 %2020 }
 0x170   : > { %5704 = vmatprep.subr.mxu1 %v6081_v0  ;;  %5688 = vmatmul.mubr.msk.f32.vlgmr.msra.gmra.mxu0 %vm350_vm3, %v1566_v39 }
 0x171   : > { %5695 = vmatmul.mubr.msk.f32.vlgmr.msra.gmra.mxu1 %vm350_vm3, %v1640_v38  ;;  %5698 = vmatpush3.msra.mxu0 %v6159_v8  ;;  %v2095_v44 = vpop.permute.xlu1 %2094 }
 0x172   : > { %5705 = vmatpush3.msra.mxu1 %v6191_v15  ;;  %5699 = vmatprep.subr.mxu0 %v6081_v0 }
 0x173   : > { %5706 = vmatprep.subr.mxu1 %v6081_v0  ;;  %5700 = vmatpush3.msra.mxu0 %v6167_v9  ;;  %v2174_v47 = vpop.permute.xlu0 %2173 }
 0x174   : > { %5707 = vmatpush3.msra.mxu1 %v6200_v19  ;;  %5701 = vmatprep.mubr.msk.f32.mxu0 %vm6083_vm2, %v6081_v0 }
 0x175   : > { %5711 = vmatprep.subr.mxu0 %v6081_v0  ;;  %5708 = vmatprep.mubr.msk.f32.mxu1 %vm6083_vm2, %v6081_v0  ;;  %v2248_v46 = vpop.permute.xlu1 %2247 }
 0x176   : > { %5718 = vmatprep.subr.mxu1 %v6081_v0  ;;  %5702 = vmatmul.mubr.msk.f32.vlgmr.msra.gmra.mxu0 %vm350_vm3, %v1715_v41 }
 0x177   : > { %5709 = vmatmul.mubr.msk.f32.vlgmr.msra.gmra.mxu1 %vm350_vm3, %v1789_v40  ;;  %5712 = vmatpush3.msra.mxu0 %v6159_v8  ;;  %v2323_v49 = vpop.permute.xlu0 %2322 }
 0x178   : > { %5719 = vmatpush3.msra.mxu1 %v6191_v15  ;;  %5713 = vmatprep.subr.mxu0 %v6081_v0 }
 0x179   : > { %5720 = vmatprep.subr.mxu1 %v6081_v0  ;;  %5714 = vmatpush3.msra.mxu0 %v6167_v9  ;;  %v2397_v48 = vpop.permute.xlu1 %2396 }
 0x17a   : > { %5721 = vmatpush3.msra.mxu1 %v6200_v19  ;;  %5715 = vmatprep.mubr.msk.f32.mxu0 %vm6083_vm2, %v6081_v0 }
 0x17b   : > { %5725 = vmatprep.subr.mxu0 %v6081_v0  ;;  %5722 = vmatprep.mubr.msk.f32.mxu1 %vm6083_vm2, %v6081_v0  ;;  %v2476_v51 = vpop.permute.xlu0 %2475 }
 0x17c   : > { %5732 = vmatprep.subr.mxu1 %v6081_v0  ;;  %5716 = vmatmul.mubr.msk.f32.vlgmr.msra.gmra.mxu0 %vm350_vm3, %v1868_v43 }
 0x17d   : > { %5723 = vmatmul.mubr.msk.f32.vlgmr.msra.gmra.mxu1 %vm350_vm3, %v1942_v42  ;;  %5726 = vmatpush3.msra.mxu0 %v6159_v8  ;;  %v2550_v50 = vpop.permute.xlu1 %2549 }
 0x17e   : > { %5733 = vmatpush3.msra.mxu1 %v6191_v15  ;;  %5727 = vmatprep.subr.mxu0 %v6081_v0 }
 0x17f   : > { %5734 = vmatprep.subr.mxu1 %v6081_v0  ;;  %5728 = vmatpush3.msra.mxu0 %v6167_v9  ;;  %v2629_v53 = vpop.permute.xlu0 %2628 }
 0x180   : > { %5735 = vmatpush3.msra.mxu1 %v6200_v19  ;;  %5729 = vmatprep.mubr.msk.f32.mxu0 %vm6083_vm2, %v6081_v0 }
 0x181   : > { %5739 = vmatprep.subr.mxu0 %v6081_v0  ;;  %5736 = vmatprep.mubr.msk.f32.mxu1 %vm6083_vm2, %v6081_v0  ;;  %v2703_v52 = vpop.permute.xlu1 %2702 }
 0x182   : > { %5746 = vmatprep.subr.mxu1 %v6081_v0  ;;  %5730 = vmatmul.mubr.msk.f32.vlgmr.msra.gmra.mxu0 %vm350_vm3, %v2021_v45 }
 0x183   : > { %5737 = vmatmul.mubr.msk.f32.vlgmr.msra.gmra.mxu1 %vm350_vm3, %v2095_v44  ;;  %5740 = vmatpush3.msra.mxu0 %v6159_v8  ;;  %v3080_v63 = vpop.permute.xlu0 %3079 }
 0x184   : > { %5747 = vmatpush3.msra.mxu1 %v6191_v15  ;;  %5741 = vmatprep.subr.mxu0 %v6081_v0 }
 0x185   : > { %5748 = vmatprep.subr.mxu1 %v6081_v0  ;;  %5742 = vmatpush3.msra.mxu0 %v6167_v9  ;;  %v3154_v1 = vpop.permute.xlu1 %3153 }
 0x186   : > { %5749 = vmatpush3.msra.mxu1 %v6200_v19  ;;  %5743 = vmatprep.mubr.msk.f32.mxu0 %vm6083_vm2, %v6081_v0 }
 0x187   : > { %5753 = vmatprep.subr.mxu0 %v6081_v0  ;;  %5750 = vmatprep.mubr.msk.f32.mxu1 %vm6083_vm2, %v6081_v0  ;;  %v3233_v2 = vpop.permute.xlu0 %3232 }
 0x188   : > { %5760 = vmatprep.subr.mxu1 %v6081_v0  ;;  %5744 = vmatmul.mubr.msk.f32.vlgmr.msra.gmra.mxu0 %vm350_vm3, %v2174_v47 }
 0x189   : > { %5751 = vmatmul.mubr.msk.f32.vlgmr.msra.gmra.mxu1 %vm350_vm3, %v2248_v46  ;;  %5754 = vmatpush3.msra.mxu0 %v6159_v8  ;;  %v3307_v3 = vpop.permute.xlu1 %3306 }
 0x18a   : > { %5761 = vmatpush3.msra.mxu1 %v6191_v15  ;;  %5755 = vmatprep.subr.mxu0 %v6081_v0 }
 0x18b   : > { %5762 = vmatprep.subr.mxu1 %v6081_v0  ;;  %5756 = vmatpush3.msra.mxu0 %v6167_v9  ;;  %v3386_v4 = vpop.permute.xlu0 %3385 }
 0x18c   : > { %5763 = vmatpush3.msra.mxu1 %v6200_v19  ;;  %5757 = vmatprep.mubr.msk.f32.mxu0 %vm6083_vm2, %v6081_v0 }
 0x18d   : > { %5767 = vmatprep.subr.mxu0 %v6081_v0  ;;  %5764 = vmatprep.mubr.msk.f32.mxu1 %vm6083_vm2, %v6081_v0  ;;  %v3460_v5 = vpop.permute.xlu1 %3459 }
 0x18e   : > { %5774 = vmatprep.subr.mxu1 %v6081_v0  ;;  %5758 = vmatmul.mubr.msk.f32.vlgmr.msra.gmra.mxu0 %vm350_vm3, %v2323_v49 }
 0x18f   : > { %5765 = vmatmul.mubr.msk.f32.vlgmr.msra.gmra.mxu1 %vm350_vm3, %v2397_v48  ;;  %5768 = vmatpush3.msra.mxu0 %v6159_v8  ;;  %v3535_v6 = vpop.permute.xlu0 %3534 }
 0x190   : > { %5775 = vmatpush3.msra.mxu1 %v6191_v15  ;;  %5769 = vmatprep.subr.mxu0 %v6081_v0 }
 0x191   : > { %5776 = vmatprep.subr.mxu1 %v6081_v0  ;;  %5770 = vmatpush3.msra.mxu0 %v6167_v9  ;;  %v3609_v7 = vpop.permute.xlu1 %3608 }
 0x192   : > { %5777 = vmatpush3.msra.mxu1 %v6200_v19  ;;  %5771 = vmatprep.mubr.msk.f32.mxu0 %vm6083_vm2, %v6081_v0 }
 0x193   : > { %5781 = vmatprep.subr.mxu0 %v6081_v0  ;;  %5778 = vmatprep.mubr.msk.f32.mxu1 %vm6083_vm2, %v6081_v0  ;;  %v3688_v10 = vpop.permute.xlu0 %3687 }
 0x194   : > { %5788 = vmatprep.subr.mxu1 %v6081_v0  ;;  %5772 = vmatmul.mubr.msk.f32.vlgmr.msra.gmra.mxu0 %vm350_vm3, %v2476_v51 }
 0x195   : > { %5779 = vmatmul.mubr.msk.f32.vlgmr.msra.gmra.mxu1 %vm350_vm3, %v2550_v50  ;;  %5782 = vmatpush3.msra.mxu0 %v6159_v8  ;;  %v3762_v11 = vpop.permute.xlu1 %3761 }
 0x196   : > { %5789 = vmatpush3.msra.mxu1 %v6191_v15  ;;  %5783 = vmatprep.subr.mxu0 %v6081_v0 }
 0x197   : > { %5790 = vmatprep.subr.mxu1 %v6081_v0  ;;  %5784 = vmatpush3.msra.mxu0 %v6167_v9  ;;  %v3841_v12 = vpop.permute.xlu0 %3840 }
 0x198   : > { %5791 = vmatpush3.msra.mxu1 %v6200_v19  ;;  %5785 = vmatprep.mubr.msk.f32.mxu0 %vm6083_vm2, %v6081_v0 }
 0x199   : > { %5795 = vmatprep.subr.mxu0 %v6081_v0  ;;  %5792 = vmatprep.mubr.msk.f32.mxu1 %vm6083_vm2, %v6081_v0  ;;  %v419_v54 = vpop.f32.mrf.mxu1  ;;  %v3915_v13 = vpop.permute.xlu1 %3914 }
 0x19a   : > { %5802 = vmatprep.subr.mxu1 %v6081_v0  ;;  %5786 = vmatmul.mubr.msk.f32.vlgmr.msra.gmra.mxu0 %vm350_vm3, %v2629_v53 }
 0x19b   : > { %5793 = vmatmul.mubr.msk.f32.vlgmr.msra.gmra.mxu1 %vm350_vm3, %v2703_v52  ;;  %5796 = vmatpush3.msra.mxu0 %v6159_v8  ;;  %v5577_v55 = vpop.f32.mrf.mxu1  ;;  %v3994_v16 = vpop.permute.xlu0 %3993 }
 0x19c   : > { %5803 = vmatpush3.msra.mxu1 %v6191_v15  ;;  %5797 = vmatprep.subr.mxu0 %v6081_v0 }
 0x19d   : > { %5804 = vmatprep.subr.mxu1 %v6081_v0  ;;  %5798 = vmatpush3.msra.mxu0 %v6167_v9  ;;  %v491_v56 = vpop.f32.mrf.mxu1  ;;  %v4068_v17 = vpop.permute.xlu1 %4067 }
 0x19e   : > { %5805 = vmatpush3.msra.mxu1 %v6200_v19  ;;  %5799 = vmatprep.mubr.msk.f32.mxu0 %vm6083_vm2, %v6081_v0  ;;  %v6530_v57 = vpop.f32.mrf.mxu0  ;;  %v492_v58 = vadd.f32 %v491_v56, %v419_v54 }
 0x19f   : > { %5809 = vmatprep.subr.mxu0 %v6081_v0  ;;  %5806 = vmatprep.mubr.msk.f32.mxu1 %vm6083_vm2, %v6081_v0  ;;  %v5584_v59 = vpop.f32.mrf.mxu1  ;;  %v4143_v18 = vpop.permute.xlu0 %4142 }
 0x1a0   : > { %5816 = vmatprep.subr.mxu1 %v6081_v0  ;;  %5800 = vmatmul.mubr.msk.f32.vlgmr.msra.gmra.mxu0 %vm350_vm3, %v6271_v24  ;;  %496 = vst.msk [vmem:[%s6523_s27] sm:$0xf] %vm495_vm4, %v492_v58  ;;  %v5591_v60 = vpop.f32.mrf.mxu0 }
 0x1a1   : > { %5807 = vmatmul.mubr.msk.f32.vlgmr.msra.gmra.mxu1 %vm350_vm3, %v6261_v21  ;;  %5810 = vmatpush3.msra.mxu0 %v6159_v8  ;;  %v4217_v20 = vpop.permute.xlu1 %4216 }
 0x1a2   : > { %5817 = vmatpush3.msra.mxu1 %v6191_v15  ;;  %5811 = vmatprep.subr.mxu0 %v6081_v0  ;;  %v6545_v61 = vpop.f32.mrf.mxu1 }
 0x1a3   : > { %5818 = vmatprep.subr.mxu1 %v6081_v0  ;;  %5812 = vmatpush3.msra.mxu0 %v6167_v9  ;;  %v640_v14 = vadd.f32 %v6545_v61, %v6530_v57  ;;  %v4296_v21 = vpop.permute.xlu0 %4295 }
 0x1a4   : > { %5819 = vmatpush3.msra.mxu1 %v6200_v19  ;;  %5813 = vmatprep.mubr.msk.f32.mxu0 %vm6083_vm2, %v6081_v0  ;;  %v5598_v62 = vpop.f32.mrf.mxu1 }
 0x1a5   : > { %5823 = vmatprep.subr.mxu0 %v6081_v0  ;;  %5820 = vmatprep.mubr.msk.f32.mxu1 %vm6083_vm2, %v6081_v0  ;;  %v4370_v22 = vpop.permute.xlu1 %4369 }
 0x1a6   : > { %5830 = vmatprep.subr.mxu1 %v6081_v0  ;;  %5814 = vmatmul.mubr.msk.f32.vlgmr.msra.gmra.mxu0 %vm350_vm3, %v6278_v25 }
 0x1a7   : > { %5821 = vmatmul.mubr.msk.f32.vlgmr.msra.gmra.mxu1 %vm350_vm3, %v6267_v23  ;;  %5824 = vmatpush3.msra.mxu0 %v6159_v8  ;;  %v4449_v23 = vpop.permute.xlu0 %4448 }
 0x1a8   : > { %5831 = vmatpush3.msra.mxu1 %v6191_v15  ;;  %5825 = vmatprep.subr.mxu0 %v6081_v0 }
 0x1a9   : > { %5832 = vmatprep.subr.mxu1 %v6081_v0  ;;  %5826 = vmatpush3.msra.mxu0 %v6167_v9  ;;  %v4523_v24 = vpop.permute.xlu1 %4522 }
 0x1aa   : > { %5833 = vmatpush3.msra.mxu1 %v6200_v19  ;;  %5827 = vmatprep.mubr.msk.f32.mxu0 %vm6083_vm2, %v6081_v0 }
 0x1ab   : > { %5837 = vmatprep.subr.mxu0 %v6081_v0  ;;  %5834 = vmatprep.mubr.msk.f32.mxu1 %vm6083_vm2, %v6081_v0  ;;  %v4602_v25 = vpop.permute.xlu0 %4601 }
 0x1ac   : > { %5844 = vmatprep.subr.mxu1 %v6081_v0  ;;  %5828 = vmatmul.mubr.msk.f32.vlgmr.msra.gmra.mxu0 %vm350_vm3, %v3080_v63 }
 0x1ad   : > { %5835 = vmatmul.mubr.msk.f32.vlgmr.msra.gmra.mxu1 %vm350_vm3, %v3154_v1  ;;  %5838 = vmatpush3.msra.mxu0 %v6159_v8  ;;  %v4676_v26 = vpop.permute.xlu1 %4675 }
 0x1ae   : > { %5845 = vmatpush3.msra.mxu1 %v6191_v15  ;;  %5839 = vmatprep.subr.mxu0 %v6081_v0 }
 0x1af   : > { %5846 = vmatprep.subr.mxu1 %v6081_v0  ;;  %5840 = vmatpush3.msra.mxu0 %v6167_v9  ;;  %v4751_v27 = vpop.permute.xlu0 %4750 }
 0x1b0   : > { %5847 = vmatpush3.msra.mxu1 %v6200_v19  ;;  %5841 = vmatprep.mubr.msk.f32.mxu0 %vm6083_vm2, %v6081_v0 }
 0x1b1   : > { %5851 = vmatprep.subr.mxu0 %v6081_v0  ;;  %5848 = vmatprep.mubr.msk.f32.mxu1 %vm6083_vm2, %v6081_v0  ;;  %v4825_v28 = vpop.permute.xlu1 %4824 }
 0x1b2   : > { %5858 = vmatprep.subr.mxu1 %v6081_v0  ;;  %5842 = vmatmul.mubr.msk.f32.vlgmr.msra.gmra.mxu0 %vm350_vm3, %v3233_v2 }
 0x1b3   : > { %5849 = vmatmul.mubr.msk.f32.vlgmr.msra.gmra.mxu1 %vm350_vm3, %v3307_v3  ;;  %5852 = vmatpush3.msra.mxu0 %v6159_v8  ;;  %v4904_v29 = vpop.permute.xlu0 %4903 }
 0x1b4   : > { %5859 = vmatpush3.msra.mxu1 %v6191_v15  ;;  %5853 = vmatprep.subr.mxu0 %v6081_v0 }
 0x1b5   : > { %5860 = vmatprep.subr.mxu1 %v6081_v0  ;;  %5854 = vmatpush3.msra.mxu0 %v6167_v9  ;;  %v4978_v30 = vpop.permute.xlu1 %4977 }
 0x1b6   : > { %5861 = vmatpush3.msra.mxu1 %v6200_v19  ;;  %5855 = vmatprep.mubr.msk.f32.mxu0 %vm6083_vm2, %v6081_v0 }
 0x1b7   : > { %5865 = vmatprep.subr.mxu0 %v6081_v0  ;;  %5862 = vmatprep.mubr.msk.f32.mxu1 %vm6083_vm2, %v6081_v0  ;;  %v5057_v31 = vpop.permute.xlu0 %5056 }
 0x1b8   : > { %5872 = vmatprep.subr.mxu1 %v6081_v0  ;;  %5856 = vmatmul.mubr.msk.f32.vlgmr.msra.gmra.mxu0 %vm350_vm3, %v3386_v4 }
 0x1b9   : > { %5863 = vmatmul.mubr.msk.f32.vlgmr.msra.gmra.mxu1 %vm350_vm3, %v3460_v5  ;;  %5866 = vmatpush3.msra.mxu0 %v6159_v8  ;;  %v5131_v32 = vpop.permute.xlu1 %5130 }
 0x1ba   : > { %5873 = vmatpush3.msra.mxu1 %v6191_v15  ;;  %5867 = vmatprep.subr.mxu0 %v6081_v0 }
 0x1bb   : > { %5874 = vmatprep.subr.mxu1 %v6081_v0  ;;  %5868 = vmatpush3.msra.mxu0 %v6167_v9 }
 0x1bc   : > { %5875 = vmatpush3.msra.mxu1 %v6200_v19  ;;  %5869 = vmatprep.mubr.msk.f32.mxu0 %vm6083_vm2, %v6081_v0 }
 0x1bd   : > { %5879 = vmatprep.subr.mxu0 %v6081_v0  ;;  %5876 = vmatprep.mubr.msk.f32.mxu1 %vm6083_vm2, %v6081_v0 }
 0x1be   : > { %5886 = vmatprep.subr.mxu1 %v6081_v0  ;;  %5870 = vmatmul.mubr.msk.f32.vlgmr.msra.gmra.mxu0 %vm350_vm3, %v3535_v6 }
 0x1bf   : > { %5877 = vmatmul.mubr.msk.f32.vlgmr.msra.gmra.mxu1 %vm350_vm3, %v3609_v7  ;;  %5880 = vmatpush3.msra.mxu0 %v6159_v8 }
 0x1c0   : > { %5887 = vmatpush3.msra.mxu1 %v6191_v15  ;;  %5881 = vmatprep.subr.mxu0 %v6081_v0 }
 0x1c1   : > { %5888 = vmatprep.subr.mxu1 %v6081_v0  ;;  %5882 = vmatpush3.msra.mxu0 %v6167_v9 }
 0x1c2   : > { %5889 = vmatpush3.msra.mxu1 %v6200_v19  ;;  %5883 = vmatprep.mubr.msk.f32.mxu0 %vm6083_vm2, %v6081_v0 }
 0x1c3   : > { %5893 = vmatprep.subr.mxu0 %v6081_v0  ;;  %5890 = vmatprep.mubr.msk.f32.mxu1 %vm6083_vm2, %v6081_v0 }
 0x1c4   : > { %5900 = vmatprep.subr.mxu1 %v6081_v0  ;;  %5884 = vmatmul.mubr.msk.f32.vlgmr.msra.gmra.mxu0 %vm350_vm3, %v3688_v10 }
 0x1c5   : > { %5891 = vmatmul.mubr.msk.f32.vlgmr.msra.gmra.mxu1 %vm350_vm3, %v3762_v11  ;;  %5894 = vmatpush3.msra.mxu0 %v6159_v8 }
 0x1c6   : > { %5901 = vmatpush3.msra.mxu1 %v6191_v15  ;;  %5895 = vmatprep.subr.mxu0 %v6081_v0 }
 0x1c7   : > { %5902 = vmatprep.subr.mxu1 %v6081_v0  ;;  %5896 = vmatpush3.msra.mxu0 %v6167_v9 }
 0x1c8   : > { %5903 = vmatpush3.msra.mxu1 %v6200_v19  ;;  %5897 = vmatprep.mubr.msk.f32.mxu0 %vm6083_vm2, %v6081_v0 }
 0x1c9   : > { %5907 = vmatprep.subr.mxu0 %v6081_v0  ;;  %5904 = vmatprep.mubr.msk.f32.mxu1 %vm6083_vm2, %v6081_v0 }
 0x1ca   : > { %5914 = vmatprep.subr.mxu1 %v6081_v0  ;;  %5898 = vmatmul.mubr.msk.f32.vlgmr.msra.gmra.mxu0 %vm350_vm3, %v3841_v12 }
 0x1cb   : > { %5905 = vmatmul.mubr.msk.f32.vlgmr.msra.gmra.mxu1 %vm350_vm3, %v3915_v13  ;;  %5908 = vmatpush3.msra.mxu0 %v6159_v8 }
 0x1cc   : > { %5915 = vmatpush3.msra.mxu1 %v6191_v15  ;;  %5909 = vmatprep.subr.mxu0 %v6081_v0 }
 0x1cd   : > { %5916 = vmatprep.subr.mxu1 %v6081_v0  ;;  %5910 = vmatpush3.msra.mxu0 %v6167_v9 }
 0x1ce   : > { %5917 = vmatpush3.msra.mxu1 %v6200_v19  ;;  %644 = vrot.lane.b32.xlu0 %v640_v14, %s6089_s22 }
 0x1cf   : > { %5911 = vmatprep.mubr.msk.f32.mxu0 %vm6083_vm2, %v6081_v0  ;;  %5921 = vmatprep.subr.mxu0 %v6081_v0 }
 0x1d0   : > { %5918 = vmatprep.mubr.msk.f32.mxu1 %vm6083_vm2, %v6081_v0  ;;  %5928 = vmatprep.subr.mxu1 %v6081_v0 }
 0x1d1   : > { %5912 = vmatmul.mubr.msk.f32.vlgmr.msra.gmra.mxu0 %vm350_vm3, %v3994_v16  ;;  %5919 = vmatmul.mubr.msk.f32.vlgmr.msra.gmra.mxu1 %vm350_vm3, %v4068_v17 }
 0x1d2   : > { %5922 = vmatpush3.msra.mxu0 %v6159_v8  ;;  %5929 = vmatpush3.msra.mxu1 %v6191_v15 }
 0x1d3   : > { %5923 = vmatprep.subr.mxu0 %v6081_v0  ;;  %5930 = vmatprep.subr.mxu1 %v6081_v0 }
 0x1d4   : > { %5924 = vmatpush3.msra.mxu0 %v6167_v9  ;;  %5931 = vmatpush3.msra.mxu1 %v6200_v19 }
 0x1d5   : > { %5925 = vmatprep.mubr.msk.f32.mxu0 %vm6083_vm2, %v6081_v0  ;;  %5935 = vmatprep.subr.mxu0 %v6081_v0 }
 0x1d6   : > { %5932 = vmatprep.mubr.msk.f32.mxu1 %vm6083_vm2, %v6081_v0  ;;  %5942 = vmatprep.subr.mxu1 %v6081_v0 }
 0x1d7   : > { %5926 = vmatmul.mubr.msk.f32.vlgmr.msra.gmra.mxu0 %vm350_vm3, %v4143_v18  ;;  %5933 = vmatmul.mubr.msk.f32.vlgmr.msra.gmra.mxu1 %vm350_vm3, %v4217_v20 }
 0x1d8   : > { %5936 = vmatpush3.msra.mxu0 %v6159_v8  ;;  %5943 = vmatpush3.msra.mxu1 %v6191_v15 }
 0x1d9   : > { %5937 = vmatprep.subr.mxu0 %v6081_v0  ;;  %5944 = vmatprep.subr.mxu1 %v6081_v0 }
 0x1da   : > { %5938 = vmatpush3.msra.mxu0 %v6167_v9  ;;  %5945 = vmatpush3.msra.mxu1 %v6200_v19 }
 0x1db   : > { %5939 = vmatprep.mubr.msk.f32.mxu0 %vm6083_vm2, %v6081_v0  ;;  %5949 = vmatprep.subr.mxu0 %v6081_v0 }
 0x1dc   : > { %5946 = vmatprep.mubr.msk.f32.mxu1 %vm6083_vm2, %v6081_v0  ;;  %5956 = vmatprep.subr.mxu1 %v6081_v0 }
 0x1dd   : > { %5940 = vmatmul.mubr.msk.f32.vlgmr.msra.gmra.mxu0 %vm350_vm3, %v4296_v21  ;;  %5947 = vmatmul.mubr.msk.f32.vlgmr.msra.gmra.mxu1 %vm350_vm3, %v4370_v22 }
 0x1de   : > { %5950 = vmatpush3.msra.mxu0 %v6159_v8  ;;  %5957 = vmatpush3.msra.mxu1 %v6191_v15 }
 0x1df   : > { %5951 = vmatprep.subr.mxu0 %v6081_v0  ;;  %5958 = vmatprep.subr.mxu1 %v6081_v0 }
 0x1e0   : > { %5952 = vmatpush3.msra.mxu0 %v6167_v9  ;;  %5959 = vmatpush3.msra.mxu1 %v6200_v19 }
 0x1e1   : > { %5953 = vmatprep.mubr.msk.f32.mxu0 %vm6083_vm2, %v6081_v0  ;;  %5963 = vmatprep.subr.mxu0 %v6081_v0 }
 0x1e2   : > { %5960 = vmatprep.mubr.msk.f32.mxu1 %vm6083_vm2, %v6081_v0  ;;  %5970 = vmatprep.subr.mxu1 %v6081_v0 }
 0x1e3   : > { %5954 = vmatmul.mubr.msk.f32.vlgmr.msra.gmra.mxu0 %vm350_vm3, %v4449_v23  ;;  %5961 = vmatmul.mubr.msk.f32.vlgmr.msra.gmra.mxu1 %vm350_vm3, %v4523_v24 }
 0x1e4   : > { %5964 = vmatpush3.msra.mxu0 %v6159_v8  ;;  %5971 = vmatpush3.msra.mxu1 %v6191_v15 }
 0x1e5   : > { %5965 = vmatprep.subr.mxu0 %v6081_v0  ;;  %5972 = vmatprep.subr.mxu1 %v6081_v0 }
 0x1e6   : > { %5966 = vmatpush3.msra.mxu0 %v6167_v9  ;;  %5973 = vmatpush3.msra.mxu1 %v6200_v19 }
 0x1e7   : > { %5967 = vmatprep.mubr.msk.f32.mxu0 %vm6083_vm2, %v6081_v0  ;;  %5977 = vmatprep.subr.mxu0 %v6081_v0 }
 0x1e8   : > { %5974 = vmatprep.mubr.msk.f32.mxu1 %vm6083_vm2, %v6081_v0  ;;  %5984 = vmatprep.subr.mxu1 %v6081_v0 }
 0x1e9   : > { %5968 = vmatmul.mubr.msk.f32.vlgmr.msra.gmra.mxu0 %vm350_vm3, %v4602_v25  ;;  %5975 = vmatmul.mubr.msk.f32.vlgmr.msra.gmra.mxu1 %vm350_vm3, %v4676_v26 }
 0x1ea   : > { %5978 = vmatpush3.msra.mxu0 %v6159_v8  ;;  %5985 = vmatpush3.msra.mxu1 %v6191_v15 }
 0x1eb   : > { %5979 = vmatprep.subr.mxu0 %v6081_v0  ;;  %5986 = vmatprep.subr.mxu1 %v6081_v0 }
 0x1ec   : > { %5980 = vmatpush3.msra.mxu0 %v6167_v9  ;;  %5987 = vmatpush3.msra.mxu1 %v6200_v19 }
 0x1ed   : > { %5981 = vmatprep.mubr.msk.f32.mxu0 %vm6083_vm2, %v6081_v0  ;;  %5991 = vmatprep.subr.mxu0 %v6081_v0 }
 0x1ee   : > { %5988 = vmatprep.mubr.msk.f32.mxu1 %vm6083_vm2, %v6081_v0  ;;  %5998 = vmatprep.subr.mxu1 %v6081_v0 }
 0x1ef   : > { %5982 = vmatmul.mubr.msk.f32.vlgmr.msra.gmra.mxu0 %vm350_vm3, %v4751_v27  ;;  %5989 = vmatmul.mubr.msk.f32.vlgmr.msra.gmra.mxu1 %vm350_vm3, %v4825_v28 }
 0x1f0   : > { %5992 = vmatpush3.msra.mxu0 %v6159_v8  ;;  %5999 = vmatpush3.msra.mxu1 %v6191_v15  ;;  %v6055_v8 = vld [vmem:[%s6858_s3 + $0x18] sm:$0xff] }
 0x1f1   : > { %5993 = vmatprep.subr.mxu0 %v6081_v0  ;;  %6000 = vmatprep.subr.mxu1 %v6081_v0 }
 0x1f2   : > { %5994 = vmatpush3.msra.mxu0 %v6167_v9  ;;  %6001 = vmatpush3.msra.mxu1 %v6200_v19  ;;  %v6056_v9 = vld [vmem:[%s6858_s3 + $0x10] sm:$0xff] }
 0x1f3   : > { %5995 = vmatprep.mubr.msk.f32.mxu0 %vm6083_vm2, %v6081_v0  ;;  %6002 = vmatprep.mubr.msk.f32.mxu1 %vm6083_vm2, %v6081_v0 }
 0x1f4   : > { %6005 = vmatprep.subr.mxu0 %v6081_v0  ;;  %6012 = vmatprep.subr.mxu1 %v6081_v0 }
 0x1f5   : > { %5996 = vmatmul.mubr.msk.f32.vlgmr.msra.gmra.mxu0 %vm350_vm3, %v4904_v29  ;;  %6003 = vmatmul.mubr.msk.f32.vlgmr.msra.gmra.mxu1 %vm350_vm3, %v4978_v30 }
 0x1f6   : > { %6006 = vmatpush3.msra.mxu0 %v6055_v8  ;;  %6013 = vmatpush3.msra.mxu1 %v6191_v15 }
 0x1f7   : > { %6007 = vmatprep.subr.mxu0 %v6081_v0  ;;  %6014 = vmatprep.subr.mxu1 %v6081_v0 }
 0x1f8   : > { %6008 = vmatpush3.msra.mxu0 %v6056_v9  ;;  %6015 = vmatpush3.msra.mxu1 %v6200_v19 }
 0x1f9   : > { %6009 = vmatprep.mubr.msk.f32.mxu0 %vm6083_vm2, %v6081_v0  ;;  %6016 = vmatprep.mubr.msk.f32.mxu1 %vm6083_vm2, %v6081_v0 }
 0x1fa   : > { %6010 = vmatmul.mubr.msk.f32.vlgmr.msra.gmra.mxu0 %vm350_vm3, %v5057_v31  ;;  %6017 = vmatmul.mubr.msk.f32.vlgmr.msra.gmra.mxu1 %vm350_vm3, %v5131_v32 }
 0x20a   : > { %v793_v15 = vpop.f32.mrf.mxu1 }
 0x20c   : > { %v5612_v33 = vpop.f32.mrf.mxu1 }
 0x20e   : > { %v719_v34 = vpop.f32.mrf.mxu0 }
 0x20f   : > { %v794_v35 = vadd.f32 %v793_v15, %v719_v34 }
 0x210   : > { %v5605_v36 = vpop.f32.mrf.mxu0 }
 0x211   : > { %798 = vrot.lane.b32.xlu0 %v794_v35, %s6087_s20 }
 0x212   : > { %v873_v19 = vpop.f32.mrf.mxu0 }
 0x213   : > { %v947_v37 = vpop.f32.mrf.mxu1 }
 0x214   : > { %v948_v38 = vadd.f32 %v947_v37, %v873_v19  ;;  %v5619_v39 = vpop.f32.mrf.mxu0 }
 0x215   : > { %v5626_v40 = vpop.f32.mrf.mxu1 }
 0x216   : > { %952 = vrot.lane.b32.xlu0 %v948_v38, %s6085_s14 }
 0x218   : > { %v1027_v0 = vpop.f32.mrf.mxu0 }
 0x219   : > { %v1101_v41 = vpop.f32.mrf.mxu1 }
 0x21a   : > { %v1102_v42 = vadd.f32 %v1101_v41, %v1027_v0  ;;  %v5633_v43 = vpop.f32.mrf.mxu0 }
 0x21b   : > { %v5640_v44 = vpop.f32.mrf.mxu1 }
 0x21c   : > { %1105 = vst.msk [vmem:[%s6523_s27 + $0x4] sm:$0xf] %vm495_vm4, %v1102_v42 }
 0x21e   : > { %v1176_v45 = vpop.f32.mrf.mxu0 }
 0x21f   : > { %v1250_v46 = vpop.f32.mrf.mxu1 }
 0x220   : > { %v1251_v47 = vadd.f32 %v1250_v46, %v1176_v45  ;;  %v5647_v48 = vpop.f32.mrf.mxu0 }
 0x221   : > { %v5654_v49 = vpop.f32.mrf.mxu1 }
 0x222   : > { %1255 = vrot.lane.b32.xlu1 %v1251_v47, %s6089_s22 }
 0x224   : > { %v1329_v50 = vpop.f32.mrf.mxu0 }
 0x225   : > { %v1403_v51 = vpop.f32.mrf.mxu1 }
 0x226   : > { %v1404_v52 = vadd.f32 %v1403_v51, %v1329_v50  ;;  %v5661_v53 = vpop.f32.mrf.mxu0 }
 0x227   : > { %v5668_v54 = vpop.f32.mrf.mxu1 }
 0x228   : > { %1408 = vrot.lane.b32.xlu1 %v1404_v52, %s6087_s20 }
 0x22a   : > { %v1482_v55 = vpop.f32.mrf.mxu0 }
 0x22b   : > { %v1556_v56 = vpop.f32.mrf.mxu1 }
 0x22c   : > { %v1557_v57 = vadd.f32 %v1556_v56, %v1482_v55  ;;  %v5675_v58 = vpop.f32.mrf.mxu0 }
 0x22d   : > { %v5682_v59 = vpop.f32.mrf.mxu1 }
 0x22e   : > { %1561 = vrot.lane.b32.xlu1 %v1557_v57, %s6085_s14 }
 0x230   : > { %v1635_v60 = vpop.f32.mrf.mxu0 }
 0x231   : > { %v1709_v61 = vpop.f32.mrf.mxu1 }
 0x232   : > { %v1710_v62 = vadd.f32 %v1709_v61, %v1635_v60  ;;  %v5689_v63 = vpop.f32.mrf.mxu0 }
 0x233   : > { %v5696_v1 = vpop.f32.mrf.mxu1 }
 0x234   : > { %1713 = vst.msk [vmem:[%s6523_s27 + $0x8] sm:$0xf] %vm495_vm4, %v1710_v62 }
 0x236   : > { %v1784_v2 = vpop.f32.mrf.mxu0 }
 0x237   : > { %v1858_v3 = vpop.f32.mrf.mxu1 }
 0x238   : > { %v1859_v4 = vadd.f32 %v1858_v3, %v1784_v2  ;;  %v5703_v5 = vpop.f32.mrf.mxu0 }
 0x239   : > { %v5710_v6 = vpop.f32.mrf.mxu1 }
 0x23a   : > { %1863 = vrot.lane.b32.xlu0 %v1859_v4, %s6089_s22 }
 0x23c   : > { %v1937_v7 = vpop.f32.mrf.mxu0 }
 0x23d   : > { %v2011_v10 = vpop.f32.mrf.mxu1 }
 0x23e   : > { %v2012_v11 = vadd.f32 %v2011_v10, %v1937_v7  ;;  %v5717_v12 = vpop.f32.mrf.mxu0 }
 0x23f   : > { %v5724_v13 = vpop.f32.mrf.mxu1 }
 0x240   : > { %v645_v14 = vpop.permute.xlu0 %644  ;;  %2016 = vrot.lane.b32.xlu0 %v2012_v11, %s6087_s20 }
 0x241   : > { %648 = vst.msk [vmem:[%s6523_s27] sm:$0xf] %vm647_vm5, %v645_v14 }
 0x242   : > { %v2090_v16 = vpop.f32.mrf.mxu0 }
 0x243   : > { %v2164_v17 = vpop.f32.mrf.mxu1 }
 0x244   : > { %v2165_v18 = vadd.f32 %v2164_v17, %v2090_v16  ;;  %v5731_v20 = vpop.f32.mrf.mxu0 }
 0x245   : > { %v5738_v21 = vpop.f32.mrf.mxu1 }
 0x246   : > { %2169 = vrot.lane.b32.xlu0 %v2165_v18, %s6085_s14 }
 0x248   : > { %v2243_v22 = vpop.f32.mrf.mxu0 }
 0x249   : > { %v2317_v23 = vpop.f32.mrf.mxu1 }
 0x24a   : > { %v2318_v24 = vadd.f32 %v2317_v23, %v2243_v22  ;;  %v5745_v25 = vpop.f32.mrf.mxu0 }
 0x24b   : > { %v5752_v26 = vpop.f32.mrf.mxu1 }
 0x24c   : > { %2321 = vst.msk [vmem:[%s6523_s27 + $0xc] sm:$0xf] %vm495_vm4, %v2318_v24 }
 0x24e   : > { %v2392_v27 = vpop.f32.mrf.mxu0 }
 0x24f   : > { %v2466_v28 = vpop.f32.mrf.mxu1 }
 0x250   : > { %v2467_v29 = vadd.f32 %v2466_v28, %v2392_v27  ;;  %v5759_v30 = vpop.f32.mrf.mxu0 }
 0x251   : > { %v5766_v8 = vpop.f32.mrf.mxu1 }
 0x252   : > { %2471 = vrot.lane.b32.xlu1 %v2467_v29, %s6089_s22 }
 0x254   : > { %v2545_v9 = vpop.f32.mrf.mxu0 }
 0x255   : > { %v2619_v31 = vpop.f32.mrf.mxu1 }
 0x256   : > { %v2620_v32 = vadd.f32 %v2619_v31, %v2545_v9  ;;  %v5773_v15 = vpop.f32.mrf.mxu0 }
 0x257   : > { %v5780_v33 = vpop.f32.mrf.mxu1 }
 0x258   : > { %2624 = vrot.lane.b32.xlu1 %v2620_v32, %s6087_s20 }
 0x25a   : > { %v2698_v34 = vpop.f32.mrf.mxu0 }
 0x25b   : > { %v2772_v35 = vpop.f32.mrf.mxu1 }
 0x25c   : > { %v2773_v36 = vadd.f32 %v2772_v35, %v2698_v34  ;;  %v5787_v19 = vpop.f32.mrf.mxu0 }
 0x25d   : > { %v5794_v37 = vpop.f32.mrf.mxu1 }
 0x25e   : > { %2777 = vrot.lane.b32.xlu1 %v2773_v36, %s6085_s14 }
 0x260   : > { %v2851_v38 = vpop.f32.mrf.mxu0 }
 0x261   : > { %v2923_v39 = vpop.f32.mrf.mxu1 }
 0x262   : > { %v2924_v40 = vadd.f32 %v2923_v39, %v2851_v38  ;;  %v5801_v0 = vpop.f32.mrf.mxu0 }
 0x263   : > { %v5808_v41 = vpop.f32.mrf.mxu1 }
 0x264   : > { %2927 = vst.msk [vmem:[%s6523_s27 + $0x10] sm:$0xf] %vm495_vm4, %v2924_v40 }
 0x266   : > { %v2998_v42 = vpop.f32.mrf.mxu0 }
 0x267   : > { %v3070_v43 = vpop.f32.mrf.mxu1 }
 0x268   : > { %v3071_v44 = vadd.f32 %v3070_v43, %v2998_v42  ;;  %v5815_v45 = vpop.f32.mrf.mxu0 }
 0x269   : > { %v5822_v46 = vpop.f32.mrf.mxu1 }
 0x26a   : > { %3075 = vrot.lane.b32.xlu0 %v3071_v44, %s6089_s22 }
 0x26c   : > { %v3149_v47 = vpop.f32.mrf.mxu0 }
 0x26d   : > { %v3223_v48 = vpop.f32.mrf.mxu1 }
 0x26e   : > { %v3224_v49 = vadd.f32 %v3223_v48, %v3149_v47  ;;  %v5829_v50 = vpop.f32.mrf.mxu0 }
 0x26f   : > { %v5836_v51 = vpop.f32.mrf.mxu1 }
 0x270   : > { %3228 = vrot.lane.b32.xlu0 %v3224_v49, %s6087_s20 }
 0x272   : > { %v3302_v52 = vpop.f32.mrf.mxu0 }
 0x273   : > { %v3376_v53 = vpop.f32.mrf.mxu1 }
 0x274   : > { %v3377_v54 = vadd.f32 %v3376_v53, %v3302_v52  ;;  %v5843_v55 = vpop.f32.mrf.mxu0 }
 0x275   : > { %v5850_v56 = vpop.f32.mrf.mxu1 }
 0x276   : > { %3381 = vrot.lane.b32.xlu0 %v3377_v54, %s6085_s14 }
 0x278   : > { %v3455_v57 = vpop.f32.mrf.mxu0 }
 0x279   : > { %v3529_v58 = vpop.f32.mrf.mxu1 }
 0x27a   : > { %v3530_v59 = vadd.f32 %v3529_v58, %v3455_v57  ;;  %v5857_v60 = vpop.f32.mrf.mxu0 }
 0x27b   : > { %v5864_v61 = vpop.f32.mrf.mxu1 }
 0x27c   : > { %3533 = vst.msk [vmem:[%s6523_s27 + $0x14] sm:$0xf] %vm495_vm4, %v3530_v59 }
 0x27e   : > { %v3604_v62 = vpop.f32.mrf.mxu0 }
 0x27f   : > { %v3678_v63 = vpop.f32.mrf.mxu1 }
 0x280   : > { %v3679_v1 = vadd.f32 %v3678_v63, %v3604_v62  ;;  %v5871_v2 = vpop.f32.mrf.mxu0 }
 0x281   : > { %v5878_v3 = vpop.f32.mrf.mxu1 }
 0x282   : > { %3683 = vrot.lane.b32.xlu1 %v3679_v1, %s6089_s22 }
 0x283   : > { %v799_v4 = vpop.permute.xlu0 %798 }
 0x284   : > { %v3757_v5 = vpop.f32.mrf.mxu0  ;;  %802 = vst.msk [vmem:[%s6523_s27] sm:$0xf] %vm801_vm6, %v799_v4 }
 0x285   : > { %v3831_v6 = vpop.f32.mrf.mxu1 }
 0x286   : > { %v3832_v7 = vadd.f32 %v3831_v6, %v3757_v5  ;;  %v5885_v10 = vpop.f32.mrf.mxu0 }
 0x287   : > { %v5892_v11 = vpop.f32.mrf.mxu1 }
 0x288   : > { %3836 = vrot.lane.b32.xlu1 %v3832_v7, %s6087_s20  ;;  %v953_v12 = vpop.permute.xlu0 %952 }
 0x289   : > { %956 = vst.msk [vmem:[%s6523_s27] sm:$0xf] %vm955_vm7, %v953_v12 }
 0x28a   : > { %v3910_v13 = vpop.f32.mrf.mxu0 }
 0x28b   : > { %v3984_v14 = vpop.f32.mrf.mxu1 }
 0x28c   : > { %v3985_v16 = vadd.f32 %v3984_v14, %v3910_v13  ;;  %v5899_v17 = vpop.f32.mrf.mxu0 }
 0x28d   : > { %v5906_v18 = vpop.f32.mrf.mxu1 }
 0x28e   : > { %3989 = vrot.lane.b32.xlu1 %v3985_v16, %s6085_s14 }
 0x291   : > { %v4063_v20 = vpop.f32.mrf.mxu0  ;;  %v4137_v21 = vpop.f32.mrf.mxu1 }
 0x292   : > { %v4138_v22 = vadd.f32 %v4137_v21, %v4063_v20 }
 0x293   : > { %v5913_v23 = vpop.f32.mrf.mxu0  ;;  %v5920_v24 = vpop.f32.mrf.mxu1 }
 0x294   : > { %4141 = vst.msk [vmem:[%s6523_s27 + $0x18] sm:$0xf] %vm495_vm4, %v4138_v22  ;;  %v1256_v25 = vpop.permute.xlu1 %1255 }
 0x295   : > { %1258 = vst.msk [vmem:[%s6523_s27 + $0x4] sm:$0xf] %vm647_vm5, %v1256_v25 }
 0x297   : > { %v4212_v26 = vpop.f32.mrf.mxu0  ;;  %v4286_v27 = vpop.f32.mrf.mxu1 }
 0x298   : > { %v4287_v28 = vadd.f32 %v4286_v27, %v4212_v26 }
 0x299   : > { %v5927_v29 = vpop.f32.mrf.mxu0  ;;  %v5934_v30 = vpop.f32.mrf.mxu1 }
 0x29a   : > { %4291 = vrot.lane.b32.xlu0 %v4287_v28, %s6089_s22  ;;  %v1409_v8 = vpop.permute.xlu1 %1408 }
 0x29b   : > { %1411 = vst.msk [vmem:[%s6523_s27 + $0x4] sm:$0xf] %vm801_vm6, %v1409_v8 }
 0x29d   : > { %v4365_v9 = vpop.f32.mrf.mxu0  ;;  %v4439_v31 = vpop.f32.mrf.mxu1 }
 0x29e   : > { %v4440_v32 = vadd.f32 %v4439_v31, %v4365_v9 }
 0x29f   : > { %v5941_v15 = vpop.f32.mrf.mxu0  ;;  %v5948_v33 = vpop.f32.mrf.mxu1 }
 0x2a0   : > { %4444 = vrot.lane.b32.xlu0 %v4440_v32, %s6087_s20  ;;  %v1562_v34 = vpop.permute.xlu1 %1561 }
 0x2a1   : > { %1564 = vst.msk [vmem:[%s6523_s27 + $0x4] sm:$0xf] %vm955_vm7, %v1562_v34 }
 0x2a3   : > { %v4518_v35 = vpop.f32.mrf.mxu0  ;;  %v4592_v36 = vpop.f32.mrf.mxu1 }
 0x2a4   : > { %v4593_v19 = vadd.f32 %v4592_v36, %v4518_v35 }
 0x2a5   : > { %v5955_v37 = vpop.f32.mrf.mxu0  ;;  %v5962_v38 = vpop.f32.mrf.mxu1 }
 0x2a6   : > { %4597 = vrot.lane.b32.xlu0 %v4593_v19, %s6085_s14 }
 0x2a9   : > { %v4671_v39 = vpop.f32.mrf.mxu0  ;;  %v4745_v40 = vpop.f32.mrf.mxu1 }
 0x2aa   : > { %v4746_v0 = vadd.f32 %v4745_v40, %v4671_v39 }
 0x2ab   : > { %v5969_v41 = vpop.f32.mrf.mxu0  ;;  %v5976_v42 = vpop.f32.mrf.mxu1 }
 0x2ac   : > { %4749 = vst.msk [vmem:[%s6523_s27 + $0x1c] sm:$0xf] %vm495_vm4, %v4746_v0  ;;  %v1864_v43 = vpop.permute.xlu0 %1863 }
 0x2ad   : > { %1866 = vst.msk [vmem:[%s6523_s27 + $0x8] sm:$0xf] %vm647_vm5, %v1864_v43 }
 0x2af   : > { %v4820_v44 = vpop.f32.mrf.mxu0  ;;  %v4894_v45 = vpop.f32.mrf.mxu1 }
 0x2b0   : > { %v4895_v46 = vadd.f32 %v4894_v45, %v4820_v44 }
 0x2b1   : > { %v5983_v47 = vpop.f32.mrf.mxu0  ;;  %v5990_v48 = vpop.f32.mrf.mxu1 }
 0x2b2   : > { %4899 = vrot.lane.b32.xlu1 %v4895_v46, %s6089_s22  ;;  %v2017_v49 = vpop.permute.xlu0 %2016 }
 0x2b3   : > { %2019 = vst.msk [vmem:[%s6523_s27 + $0x8] sm:$0xf] %vm801_vm6, %v2017_v49 }
 0x2b5   : > { %v4973_v50 = vpop.f32.mrf.mxu0  ;;  %v5047_v51 = vpop.f32.mrf.mxu1 }
 0x2b6   : > { %v5048_v52 = vadd.f32 %v5047_v51, %v4973_v50 }
 0x2b7   : > { %v5997_v53 = vpop.f32.mrf.mxu0  ;;  %v6004_v54 = vpop.f32.mrf.mxu1 }
 0x2b8   : > { %5052 = vrot.lane.b32.xlu1 %v5048_v52, %s6087_s20  ;;  %v2170_v55 = vpop.permute.xlu0 %2169 }
 0x2b9   : > { %2172 = vst.msk [vmem:[%s6523_s27 + $0x8] sm:$0xf] %vm955_vm7, %v2170_v55 }
 0x2ba   : > { %v5126_v56 = vpop.f32.mrf.mxu0  ;;  %v5200_v57 = vpop.f32.mrf.mxu1 }
 0x2bb   : > { %v5201_v58 = vadd.f32 %v5200_v57, %v5126_v56 }
 0x2bc   : > { %v6011_v59 = vpop.f32.mrf.mxu0  ;;  %v6018_v60 = vpop.f32.mrf.mxu1 }
 0x2bd   : > { %5205 = vrot.lane.b32.xlu1 %v5201_v58, %s6085_s14 }
 0x2c4   : > { %v2472_v61 = vpop.permute.xlu1 %2471 }
 0x2c5   : > { %2474 = vst.msk [vmem:[%s6523_s27 + $0xc] sm:$0xf] %vm647_vm5, %v2472_v61 }
 0x2ca   : > { %v2625_v62 = vpop.permute.xlu1 %2624 }
 0x2cb   : > { %2627 = vst.msk [vmem:[%s6523_s27 + $0xc] sm:$0xf] %vm801_vm6, %v2625_v62 }
 0x2d0   : > { %v2778_v63 = vpop.permute.xlu1 %2777 }
 0x2d1   : > { %2780 = vst.msk [vmem:[%s6523_s27 + $0xc] sm:$0xf] %vm955_vm7, %v2778_v63 }
 0x2dc   : > { %v3076_v1 = vpop.permute.xlu0 %3075 }
 0x2dd   : > { %3078 = vst.msk [vmem:[%s6523_s27 + $0x10] sm:$0xf] %vm647_vm5, %v3076_v1 }
 0x2e2   : > { %v3229_v2 = vpop.permute.xlu0 %3228 }
 0x2e3   : > { %3231 = vst.msk [vmem:[%s6523_s27 + $0x10] sm:$0xf] %vm801_vm6, %v3229_v2 }
 0x2e8   : > { %v3382_v3 = vpop.permute.xlu0 %3381 }
 0x2e9   : > { %3384 = vst.msk [vmem:[%s6523_s27 + $0x10] sm:$0xf] %vm955_vm7, %v3382_v3 }
 0x2f4   : > { %v3684_v4 = vpop.permute.xlu1 %3683 }
 0x2f5   : > { %3686 = vst.msk [vmem:[%s6523_s27 + $0x14] sm:$0xf] %vm647_vm5, %v3684_v4 }
 0x2fa   : > { %v3837_v5 = vpop.permute.xlu1 %3836 }
 0x2fb   : > { %3839 = vst.msk [vmem:[%s6523_s27 + $0x14] sm:$0xf] %vm801_vm6, %v3837_v5 }
 0x300   : > { %v3990_v6 = vpop.permute.xlu1 %3989 }
 0x301   : > { %3992 = vst.msk [vmem:[%s6523_s27 + $0x14] sm:$0xf] %vm955_vm7, %v3990_v6 }
 0x30c   : > { %v4292_v7 = vpop.permute.xlu0 %4291 }
 0x30d   : > { %4294 = vst.msk [vmem:[%s6523_s27 + $0x18] sm:$0xf] %vm647_vm5, %v4292_v7 }
 0x312   : > { %v4445_v10 = vpop.permute.xlu0 %4444 }
 0x313   : > { %4447 = vst.msk [vmem:[%s6523_s27 + $0x18] sm:$0xf] %vm801_vm6, %v4445_v10 }
 0x318   : > { %v4598_v11 = vpop.permute.xlu0 %4597 }
 0x319   : > { %4600 = vst.msk [vmem:[%s6523_s27 + $0x18] sm:$0xf] %vm955_vm7, %v4598_v11 }
 0x324   : > { %v4900_v12 = vpop.permute.xlu1 %4899 }
 0x325   : > { %4902 = vst.msk [vmem:[%s6523_s27 + $0x1c] sm:$0xf] %vm647_vm5, %v4900_v12 }
 0x32a   : > { %v5053_v13 = vpop.permute.xlu1 %5052 }
 0x32b   : > { %5055 = vst.msk [vmem:[%s6523_s27 + $0x1c] sm:$0xf] %vm801_vm6, %v5053_v13 }
 0x32f   : > { %v5206_v14 = vpop.permute.xlu1 %5205 }
 0x330   : > { %5208 = vst.msk [vmem:[%s6523_s27 + $0x1c] sm:$0xf] %vm955_vm7, %v5206_v14 }
 0x331 PF: > { %s14_s17 = sadd.s32 1, %s6079_s17   ;;  %s6860_s15 = smov %s6075_s16 }
 0x332   : > { %p11_p5 = scmp.ge.s32.totalorder %s14_s17, 4   ;;  %s6861_s16 = smov %s6863_s18 }
 0x334   :  { %13 = sbr.rel (!%p11_p5) target bundleno = 2 (0x2), region = 67 }

</bundles_post_ra>
